<compile_context>
chip_gen: v5e
topology: v5e:2x2
jax: 0.10.0
libtpu: 0.0.40
codegen_flags: <defaults>
</compile_context>

<pallas_src>
import functools
import math

import jax
import jax.numpy as jnp
from jax import lax
from jax.experimental import pallas as pl
from jax.experimental.pallas import tpu as pltpu


def _layernorm(x, w, b, eps=1e-5):
    mu = jnp.mean(x, axis=-1, keepdims=True)
    xc = x - mu
    var = jnp.mean(xc * xc, axis=-1, keepdims=True)
    return xc * lax.rsqrt(var + eps) * w + b


# --------------------------------------------------------------------------
# Kernel 1: multi-head cross-attention block + FFN -> x2n  (single grid step)
# --------------------------------------------------------------------------
def block_kernel(enc_ref, encT_ref, dec_ref,
                 wq_ref, wkT_ref, wv_ref,
                 wo_ref, bo_ref,
                 ln1w_ref, ln1b_ref,
                 ff1w_ref, ff1b_ref,
                 ff2w_ref, ff2b_ref,
                 ln2w_ref, ln2b_ref,
                 x2n_ref, *, heads, a_dim, scale):
    f32 = jnp.float32
    bf16 = jnp.bfloat16

    enc = enc_ref[...]                                   # (L_enc, e_dim) bf16
    encT = encT_ref[...]                                 # (e_dim, L_enc) bf16
    dec = dec_ref[...]                                   # (L_dec, d_dim) bf16

    # Fused per-head in-projections (weights pre-stacked in the wrapper):
    #   q : (L_dec, H*a)     kT : (H*a, L_enc)     v : (L_enc, H*a)
    q = jnp.dot(dec, wq_ref[...], preferred_element_type=f32).astype(bf16)
    kT = jnp.dot(wkT_ref[...], encT, preferred_element_type=f32).astype(bf16)
    v = jnp.dot(enc, wv_ref[...], preferred_element_type=f32).astype(bf16)

    # Per-head scaled dot-product attention (static unroll), AV tiles gathered
    # into a 128-aligned concat -> single K = heads*a_dim matmul against W_O.
    avs = []
    for h in range(heads):
        sl = slice(h * a_dim, (h + 1) * a_dim)           # 128-aligned slices
        s = jnp.dot(q[:, sl], kT[sl, :], preferred_element_type=f32) * scale
        s = s - jnp.max(s, axis=-1, keepdims=True)
        p = jnp.exp(s)
        p = p / jnp.sum(p, axis=-1, keepdims=True)
        av = jnp.dot(p.astype(bf16), v[:, sl], preferred_element_type=f32)
        avs.append(av.astype(bf16))
    cat = jnp.concatenate(avs, axis=-1)                  # (L_dec, H*a) bf16

    attn = jnp.dot(cat, wo_ref[...], preferred_element_type=f32) + bo_ref[...]

    # LayerNorm 1 applied directly to W_O output (module has no residual here).
    x1n = _layernorm(attn, ln1w_ref[...], ln1b_ref[...])

    # FF -> ReLU -> FF2, skip into LayerNorm 2.
    h1 = jnp.dot(x1n.astype(bf16), ff1w_ref[...],
                 preferred_element_type=f32) + ff1b_ref[...]
    h1 = jnp.maximum(h1, 0.0)
    h2 = jnp.dot(h1.astype(bf16), ff2w_ref[...],
                 preferred_element_type=f32) + ff2b_ref[...]
    x2n = _layernorm(h2 + x1n, ln2w_ref[...], ln2b_ref[...])
    x2n_ref[...] = x2n.astype(x2n_ref.dtype)


# --------------------------------------------------------------------------
# Kernel 2: lm_head, tiled over the vocab axis (lane-dense output tiles)
# --------------------------------------------------------------------------
def lm_head_kernel(x_ref, wlm_ref, out_ref):
    out_ref[...] = jnp.dot(x_ref[...], wlm_ref[...],
                           preferred_element_type=jnp.float32
                           ).astype(out_ref.dtype)


def _vmem_limit(nbytes):
    # Footprint-derived budget with 2x double-buffer margin + 4 MiB headroom,
    # clamped so it also fits v7x's 64 MiB physical VMEM.
    return int(min(max(2 * nbytes + (4 << 20), 16 << 20), 48 << 20))


def multihead_model_forward(encoder_x, decoder_x, params, heads, *,
                            vocab_tile=512):
    L_enc, e_dim = encoder_x.shape
    L_dec, d_dim = decoder_x.shape
    H, _, a_dim = params["wq"].shape
    assert H == heads
    vocab = params["wlm"].shape[0]
    assert vocab_tile % 128 == 0

    bf16, f32 = jnp.bfloat16, jnp.float32

    # ---- one-time wrapper-side layout prep (outside the kernels) ----
    # WQ/WV stacked to (in, heads*a_dim); WK stacked transposed so that
    # K^T = wkT @ enc^T is a plain NN matmul in-kernel (no XLU transpose).
    wq = jnp.transpose(params["wq"], (1, 0, 2)).reshape(d_dim, heads * a_dim).astype(bf16)
    wkT = jnp.transpose(params["wk"], (0, 2, 1)).reshape(heads * a_dim, e_dim).astype(bf16)
    wv = jnp.transpose(params["wv"], (1, 0, 2)).reshape(e_dim, heads * a_dim).astype(bf16)
    # W_O (torch (out,in) = (d_dim, heads*a_dim)) -> (heads*a_dim, d_dim).
    wo = params["wo"].T.astype(bf16)
    # FFN / lm_head weights pre-transposed to (in, out); vocab lands on lanes.
    ff1w = params["ff1_w"].T.astype(bf16)
    ff2w = params["ff2_w"].T.astype(bf16)
    wlm = params["wlm"].T.astype(bf16)                   # (d_dim, vocab)

    bo = params["bo"].reshape(1, d_dim).astype(f32)
    ff1b = params["ff1_b"].reshape(1, d_dim).astype(f32)
    ff2b = params["ff2_b"].reshape(1, d_dim).astype(f32)
    ln1w = params["ln1_w"].reshape(1, d_dim).astype(f32)
    ln1b = params["ln1_b"].reshape(1, d_dim).astype(f32)
    ln2w = params["ln2_w"].reshape(1, d_dim).astype(f32)
    ln2b = params["ln2_b"].reshape(1, d_dim).astype(f32)

    enc = encoder_x.astype(bf16)
    encT = encoder_x.T.astype(bf16)
    dec = decoder_x.astype(bf16)

    # Pad vocab up to a tile multiple (real GPT2-XL vocab 50257 needs this).
    n_tiles = pl.cdiv(vocab, vocab_tile)
    vocab_pad = n_tiles * vocab_tile
    if vocab_pad != vocab:
        wlm = jnp.pad(wlm, ((0, 0), (0, vocab_pad - vocab)))

    def full(arr):
        n = arr.ndim
        return pl.BlockSpec(arr.shape, lambda i, _n=n: (0,) * _n)

    # ---- call 1: transformer block -> x2n (bf16, (L_dec, d_dim)) ----
    block_inputs = (enc, encT, dec, wq, wkT, wv, wo, bo,
                    ln1w, ln1b, ff1w, ff1b, ff2w, ff2b, ln2w, ln2b)
    block_bytes = sum(a.size * a.dtype.itemsize for a in block_inputs) \
        + L_dec * d_dim * 2

    x2n = pl.pallas_call(
        functools.partial(block_kernel, heads=heads, a_dim=a_dim,
                          scale=1.0 / math.sqrt(d_dim)),
        out_shape=jax.ShapeDtypeStruct((L_dec, d_dim), bf16),
        grid=(1,),
        in_specs=[full(a) for a in block_inputs],
        out_specs=pl.BlockSpec((L_dec, d_dim), lambda i: (0, 0)),
        compiler_params=pltpu.CompilerParams(
            dimension_semantics=("arbitrary",),
            vmem_limit_bytes=_vmem_limit(block_bytes)),
    )(*block_inputs)

    # ---- call 2: lm_head, vocab-tiled, megacore-parallel over vocab ----
    step_bytes = (L_dec * d_dim * 2                      # x2n
                  + d_dim * vocab_tile * 2               # wlm tile
                  + L_dec * vocab_tile * 4)              # out tile
    cost = pl.CostEstimate(
        flops=2 * L_dec * d_dim * vocab_pad,
        transcendentals=0,
        bytes_accessed=d_dim * vocab_pad * 2 + L_dec * d_dim * 2
        + L_dec * vocab_pad * 4)

    logits = pl.pallas_call(
        lm_head_kernel,
        out_shape=jax.ShapeDtypeStruct((L_dec, vocab_pad), jnp.float32),
        grid=(n_tiles,),
        in_specs=[
            pl.BlockSpec((L_dec, d_dim), lambda v: (0, 0)),
            pl.BlockSpec((d_dim, vocab_tile), lambda v: (0, v)),
        ],
        out_specs=pl.BlockSpec((L_dec, vocab_tile), lambda v: (0, v)),
        compiler_params=pltpu.CompilerParams(
            dimension_semantics=("parallel",),
            vmem_limit_bytes=_vmem_limit(step_bytes)),
        cost_estimate=cost,
    )(x2n, wlm)

    if vocab_pad != vocab:
        logits = logits[:, :vocab]
    return logits


def _reference_forward(encoder_x, decoder_x, params, heads):
    """Pure-JAX f32 reference mirroring the PyTorch module exactly."""
    e = encoder_x.astype(jnp.float32)
    d = decoder_x.astype(jnp.float32)
    d_dim = d.shape[-1]
    scale = 1.0 / math.sqrt(d_dim)

    outs = []
    for h in range(heads):
        Q = d @ params["wq"][h]
        K = e @ params["wk"][h]
        V = e @ params["wv"][h]
        S = (Q @ K.T) * scale
        P = jax.nn.softmax(S, axis=1)
        outs.append(P @ V)
    cat = jnp.concatenate(outs, axis=1)
    attn = cat @ params["wo"].T + params["bo"]

    def ln(x, w, b):
        mu = jnp.mean(x, axis=-1, keepdims=True)
        var = jnp.mean((x - mu) ** 2, axis=-1, keepdims=True)
        return (x - mu) * lax.rsqrt(var + 1e-5) * w + b

    x1n = ln(attn, params["ln1_w"], params["ln1_b"])
    h1 = jnp.maximum(x1n @ params["ff1_w"].T + params["ff1_b"], 0.0)
    h2 = h1 @ params["ff2_w"].T + params["ff2_b"]
    x2n = ln(h2 + x1n, params["ln2_w"], params["ln2_b"])
    return x2n @ params["wlm"].T


def make_params(key, e_dim, d_dim, heads, a_dim, vocab):
    ks = jax.random.split(key, 10)
    s = 0.05
    return {
        "wq": s * jax.random.normal(ks[0], (heads, d_dim, a_dim), jnp.float32),
        "wk": s * jax.random.normal(ks[1], (heads, e_dim, a_dim), jnp.float32),
        "wv": s * jax.random.normal(ks[2], (heads, e_dim, a_dim), jnp.float32),
        "wo": s * jax.random.normal(ks[3], (d_dim, heads * a_dim), jnp.float32),
        "bo": s * jax.random.normal(ks[4], (d_dim,), jnp.float32),
        "ln1_w": jnp.ones((d_dim,), jnp.float32),
        "ln1_b": jnp.zeros((d_dim,), jnp.float32),
        "ff1_w": s * jax.random.normal(ks[5], (d_dim, d_dim), jnp.float32),
        "ff1_b": s * jax.random.normal(ks[6], (d_dim,), jnp.float32),
        "ff2_w": s * jax.random.normal(ks[7], (d_dim, d_dim), jnp.float32),
        "ff2_b": s * jax.random.normal(ks[8], (d_dim,), jnp.float32),
        "ln2_w": jnp.ones((d_dim,), jnp.float32),
        "ln2_b": jnp.zeros((d_dim,), jnp.float32),
        # TODO(synk): pretrained GPT2-XL lm_head weights cannot be loaded
        # in-script; a random bias-free Linear(d_dim -> vocab) stand-in is used.
        "wlm": s * jax.random.normal(ks[9], (vocab, d_dim), jnp.float32),
    }


if __name__ == "__main__":
    # Small, lane-friendly shapes consistent with the module (torch.mm -> 2-D).
    L_enc, L_dec = 16, 8
    e_dim, d_dim, heads, vocab = 64, 128, 4, 512
    a_dim = d_dim  # module default: attention_dim = decoder_dim

    key = jax.random.PRNGKey(0)
    k_enc, k_dec, k_par = jax.random.split(key, 3)
    encoder_x = jax.random.normal(k_enc, (L_enc, e_dim), jnp.float32)
    decoder_x = jax.random.normal(k_dec, (L_dec, d_dim), jnp.float32)
    params = make_params(k_par, e_dim, d_dim, heads, a_dim, vocab)

    # Round inputs/weights to bf16 once so the reference comparison isolates the
    # kernel's internal (bf16-operand, f32-accumulate) arithmetic.
    rt = lambda a: a.astype(jnp.bfloat16).astype(jnp.float32)
    encoder_x, decoder_x = rt(encoder_x), rt(decoder_x)
    params = jax.tree_util.tree_map(rt, params)

    out = multihead_model_forward(encoder_x, decoder_x, params, heads,
                                  vocab_tile=512)
    out = jax.block_until_ready(out)

    ref = _reference_forward(encoder_x, decoder_x, params, heads)
    assert out.shape == (L_dec, vocab)
    assert jnp.allclose(out, ref, atol=5e-2, rtol=5e-2), \
        float(jnp.max(jnp.abs(out - ref)))

    print("KERNEL_OK")
</pallas_src>

<mosaic_0001>
module attributes {stable_mosaic.version = 11 : i64} {
  func.func @block_kernel(%arg0: i32, %arg1: memref<16x64xbf16, #tpu.memory_space<vmem>>, %arg2: memref<64x16xbf16, #tpu.memory_space<vmem>>, %arg3: memref<8x128xbf16, #tpu.memory_space<vmem>>, %arg4: memref<128x512xbf16, #tpu.memory_space<vmem>>, %arg5: memref<512x64xbf16, #tpu.memory_space<vmem>>, %arg6: memref<64x512xbf16, #tpu.memory_space<vmem>>, %arg7: memref<512x128xbf16, #tpu.memory_space<vmem>>, %arg8: memref<1x128xf32, #tpu.memory_space<vmem>>, %arg9: memref<1x128xf32, #tpu.memory_space<vmem>>, %arg10: memref<1x128xf32, #tpu.memory_space<vmem>>, %arg11: memref<128x128xbf16, #tpu.memory_space<vmem>>, %arg12: memref<1x128xf32, #tpu.memory_space<vmem>>, %arg13: memref<128x128xbf16, #tpu.memory_space<vmem>>, %arg14: memref<1x128xf32, #tpu.memory_space<vmem>>, %arg15: memref<1x128xf32, #tpu.memory_space<vmem>>, %arg16: memref<1x128xf32, #tpu.memory_space<vmem>>, %arg17: memref<8x128xbf16, #tpu.memory_space<vmem>>) attributes {dimension_semantics = [#tpu.dimension_semantics<arbitrary>], iteration_bounds = array<i64: 1>, scalar_prefetch = 0 : i64, scratch_operands = 0 : i64, tpu.core_type = #tpu.core_type<tc>, window_params = [{pipeline_mode = #tpu.pipeline_mode<synchronous>, transform_indices = @transform_0, window_bounds = array<i64: 16, 64>}, {pipeline_mode = #tpu.pipeline_mode<synchronous>, transform_indices = @transform_1, window_bounds = array<i64: 64, 16>}, {pipeline_mode = #tpu.pipeline_mode<synchronous>, transform_indices = @transform_2, window_bounds = array<i64: 8, 128>}, {pipeline_mode = #tpu.pipeline_mode<synchronous>, transform_indices = @transform_3, window_bounds = array<i64: 128, 512>}, {pipeline_mode = #tpu.pipeline_mode<synchronous>, transform_indices = @transform_4, window_bounds = array<i64: 512, 64>}, {pipeline_mode = #tpu.pipeline_mode<synchronous>, transform_indices = @transform_5, window_bounds = array<i64: 64, 512>}, {pipeline_mode = #tpu.pipeline_mode<synchronous>, transform_indices = @transform_6, window_bounds = array<i64: 512, 128>}, {pipeline_mode = #tpu.pipeline_mode<synchronous>, transform_indices = @transform_7, window_bounds = array<i64: 1, 128>}, {pipeline_mode = #tpu.pipeline_mode<synchronous>, transform_indices = @transform_8, window_bounds = array<i64: 1, 128>}, {pipeline_mode = #tpu.pipeline_mode<synchronous>, transform_indices = @transform_9, window_bounds = array<i64: 1, 128>}, {pipeline_mode = #tpu.pipeline_mode<synchronous>, transform_indices = @transform_10, window_bounds = array<i64: 128, 128>}, {pipeline_mode = #tpu.pipeline_mode<synchronous>, transform_indices = @transform_11, window_bounds = array<i64: 1, 128>}, {pipeline_mode = #tpu.pipeline_mode<synchronous>, transform_indices = @transform_12, window_bounds = array<i64: 128, 128>}, {pipeline_mode = #tpu.pipeline_mode<synchronous>, transform_indices = @transform_13, window_bounds = array<i64: 1, 128>}, {pipeline_mode = #tpu.pipeline_mode<synchronous>, transform_indices = @transform_14, window_bounds = array<i64: 1, 128>}, {pipeline_mode = #tpu.pipeline_mode<synchronous>, transform_indices = @transform_15, window_bounds = array<i64: 1, 128>}, {pipeline_mode = #tpu.pipeline_mode<synchronous>, transform_indices = @transform_16, window_bounds = array<i64: 8, 128>}]} {
    %c0 = arith.constant 0 : index
    %c0_0 = arith.constant 0 : index
    %0 = vector.load %arg1[%c0, %c0_0] : memref<16x64xbf16, #tpu.memory_space<vmem>>, vector<16x64xbf16>
    %c0_1 = arith.constant 0 : index
    %c0_2 = arith.constant 0 : index
    %1 = vector.load %arg2[%c0_1, %c0_2] : memref<64x16xbf16, #tpu.memory_space<vmem>>, vector<64x16xbf16>
    %c0_3 = arith.constant 0 : index
    %c0_4 = arith.constant 0 : index
    %2 = vector.load %arg3[%c0_3, %c0_4] : memref<8x128xbf16, #tpu.memory_space<vmem>>, vector<8x128xbf16>
    %c0_5 = arith.constant 0 : index
    %c0_6 = arith.constant 0 : index
    %3 = vector.load %arg4[%c0_5, %c0_6] : memref<128x512xbf16, #tpu.memory_space<vmem>>, vector<128x512xbf16>
    %cst = arith.constant dense<0.000000e+00> : vector<8x512xf32>
    %4 = tpu.matmul %2, %3, %cst {dimension_numbers = #tpu.dot_dimension_numbers<[1], [0], [0], [1], [0, 0, 1, 1], [], []>} : vector<8x128xbf16>, vector<128x512xbf16>, vector<8x512xf32> -> vector<8x512xf32>
    %5 = arith.truncf %4 : vector<8x512xf32> to vector<8x512xbf16>
    %c0_7 = arith.constant 0 : index
    %c0_8 = arith.constant 0 : index
    %6 = vector.load %arg5[%c0_7, %c0_8] : memref<512x64xbf16, #tpu.memory_space<vmem>>, vector<512x64xbf16>
    %cst_9 = arith.constant dense<0.000000e+00> : vector<512x16xf32>
    %7 = tpu.matmul %6, %1, %cst_9 {dimension_numbers = #tpu.dot_dimension_numbers<[1], [0], [0], [1], [0, 0, 1, 1], [], []>} : vector<512x64xbf16>, vector<64x16xbf16>, vector<512x16xf32> -> vector<512x16xf32>
    %8 = arith.truncf %7 : vector<512x16xf32> to vector<512x16xbf16>
    %c0_10 = arith.constant 0 : index
    %c0_11 = arith.constant 0 : index
    %9 = vector.load %arg6[%c0_10, %c0_11] : memref<64x512xbf16, #tpu.memory_space<vmem>>, vector<64x512xbf16>
    %cst_12 = arith.constant dense<0.000000e+00> : vector<16x512xf32>
    %10 = tpu.matmul %0, %9, %cst_12 {dimension_numbers = #tpu.dot_dimension_numbers<[1], [0], [0], [1], [0, 0, 1, 1], [], []>} : vector<16x64xbf16>, vector<64x512xbf16>, vector<16x512xf32> -> vector<16x512xf32>
    %11 = arith.truncf %10 : vector<16x512xf32> to vector<16x512xbf16>
    %12 = vector.extract_strided_slice %5 {offsets = [0, 0], sizes = [8, 128], strides = [1, 1]} : vector<8x512xbf16> to vector<8x128xbf16>
    %13 = vector.extract_strided_slice %8 {offsets = [0, 0], sizes = [128, 16], strides = [1, 1]} : vector<512x16xbf16> to vector<128x16xbf16>
    %cst_13 = arith.constant dense<0.000000e+00> : vector<8x16xf32>
    %14 = tpu.matmul %12, %13, %cst_13 {dimension_numbers = #tpu.dot_dimension_numbers<[1], [0], [0], [1], [0, 0, 1, 1], [], []>} : vector<8x128xbf16>, vector<128x16xbf16>, vector<8x16xf32> -> vector<8x16xf32>
    %cst_14 = arith.constant 0.0883883461 : f32
    %15 = vector.broadcast %cst_14 : f32 to vector<8x16xf32>
    %16 = arith.mulf %14, %15 : vector<8x16xf32>
    %cst_15 = arith.constant dense<0xFF800000> : vector<8xf32>
    %17 = vector.multi_reduction <maximumf>, %16, %cst_15 [1] : vector<8x16xf32> to vector<8xf32>
    %18 = vector.shape_cast %17 : vector<8xf32> to vector<8x1xf32>
    %19 = vector.broadcast %18 : vector<8x1xf32> to vector<8x16xf32>
    %20 = arith.subf %16, %19 : vector<8x16xf32>
    %21 = math.exp %20 : vector<8x16xf32>
    %cst_16 = arith.constant dense<0.000000e+00> : vector<8xf32>
    %22 = vector.multi_reduction <add>, %21, %cst_16 [1] : vector<8x16xf32> to vector<8xf32>
    %23 = vector.shape_cast %22 : vector<8xf32> to vector<8x1xf32>
    %24 = vector.broadcast %23 : vector<8x1xf32> to vector<8x16xf32>
    %25 = arith.divf %21, %24 : vector<8x16xf32>
    %26 = arith.truncf %25 : vector<8x16xf32> to vector<8x16xbf16>
    %27 = vector.extract_strided_slice %11 {offsets = [0, 0], sizes = [16, 128], strides = [1, 1]} : vector<16x512xbf16> to vector<16x128xbf16>
    %cst_17 = arith.constant dense<0.000000e+00> : vector<8x128xf32>
    %28 = tpu.matmul %26, %27, %cst_17 {dimension_numbers = #tpu.dot_dimension_numbers<[1], [0], [0], [1], [0, 0, 1, 1], [], []>} : vector<8x16xbf16>, vector<16x128xbf16>, vector<8x128xf32> -> vector<8x128xf32>
    %29 = arith.truncf %28 : vector<8x128xf32> to vector<8x128xbf16>
    %30 = vector.extract_strided_slice %5 {offsets = [0, 128], sizes = [8, 128], strides = [1, 1]} : vector<8x512xbf16> to vector<8x128xbf16>
    %31 = vector.extract_strided_slice %8 {offsets = [128, 0], sizes = [128, 16], strides = [1, 1]} : vector<512x16xbf16> to vector<128x16xbf16>
    %cst_18 = arith.constant dense<0.000000e+00> : vector<8x16xf32>
    %32 = tpu.matmul %30, %31, %cst_18 {dimension_numbers = #tpu.dot_dimension_numbers<[1], [0], [0], [1], [0, 0, 1, 1], [], []>} : vector<8x128xbf16>, vector<128x16xbf16>, vector<8x16xf32> -> vector<8x16xf32>
    %cst_19 = arith.constant 0.0883883461 : f32
    %33 = vector.broadcast %cst_19 : f32 to vector<8x16xf32>
    %34 = arith.mulf %32, %33 : vector<8x16xf32>
    %cst_20 = arith.constant dense<0xFF800000> : vector<8xf32>
    %35 = vector.multi_reduction <maximumf>, %34, %cst_20 [1] : vector<8x16xf32> to vector<8xf32>
    %36 = vector.shape_cast %35 : vector<8xf32> to vector<8x1xf32>
    %37 = vector.broadcast %36 : vector<8x1xf32> to vector<8x16xf32>
    %38 = arith.subf %34, %37 : vector<8x16xf32>
    %39 = math.exp %38 : vector<8x16xf32>
    %cst_21 = arith.constant dense<0.000000e+00> : vector<8xf32>
    %40 = vector.multi_reduction <add>, %39, %cst_21 [1] : vector<8x16xf32> to vector<8xf32>
    %41 = vector.shape_cast %40 : vector<8xf32> to vector<8x1xf32>
    %42 = vector.broadcast %41 : vector<8x1xf32> to vector<8x16xf32>
    %43 = arith.divf %39, %42 : vector<8x16xf32>
    %44 = arith.truncf %43 : vector<8x16xf32> to vector<8x16xbf16>
    %45 = vector.extract_strided_slice %11 {offsets = [0, 128], sizes = [16, 128], strides = [1, 1]} : vector<16x512xbf16> to vector<16x128xbf16>
    %cst_22 = arith.constant dense<0.000000e+00> : vector<8x128xf32>
    %46 = tpu.matmul %44, %45, %cst_22 {dimension_numbers = #tpu.dot_dimension_numbers<[1], [0], [0], [1], [0, 0, 1, 1], [], []>} : vector<8x16xbf16>, vector<16x128xbf16>, vector<8x128xf32> -> vector<8x128xf32>
    %47 = arith.truncf %46 : vector<8x128xf32> to vector<8x128xbf16>
    %48 = vector.extract_strided_slice %5 {offsets = [0, 256], sizes = [8, 128], strides = [1, 1]} : vector<8x512xbf16> to vector<8x128xbf16>
    %49 = vector.extract_strided_slice %8 {offsets = [256, 0], sizes = [128, 16], strides = [1, 1]} : vector<512x16xbf16> to vector<128x16xbf16>
    %cst_23 = arith.constant dense<0.000000e+00> : vector<8x16xf32>
    %50 = tpu.matmul %48, %49, %cst_23 {dimension_numbers = #tpu.dot_dimension_numbers<[1], [0], [0], [1], [0, 0, 1, 1], [], []>} : vector<8x128xbf16>, vector<128x16xbf16>, vector<8x16xf32> -> vector<8x16xf32>
    %cst_24 = arith.constant 0.0883883461 : f32
    %51 = vector.broadcast %cst_24 : f32 to vector<8x16xf32>
    %52 = arith.mulf %50, %51 : vector<8x16xf32>
    %cst_25 = arith.constant dense<0xFF800000> : vector<8xf32>
    %53 = vector.multi_reduction <maximumf>, %52, %cst_25 [1] : vector<8x16xf32> to vector<8xf32>
    %54 = vector.shape_cast %53 : vector<8xf32> to vector<8x1xf32>
    %55 = vector.broadcast %54 : vector<8x1xf32> to vector<8x16xf32>
    %56 = arith.subf %52, %55 : vector<8x16xf32>
    %57 = math.exp %56 : vector<8x16xf32>
    %cst_26 = arith.constant dense<0.000000e+00> : vector<8xf32>
    %58 = vector.multi_reduction <add>, %57, %cst_26 [1] : vector<8x16xf32> to vector<8xf32>
    %59 = vector.shape_cast %58 : vector<8xf32> to vector<8x1xf32>
    %60 = vector.broadcast %59 : vector<8x1xf32> to vector<8x16xf32>
    %61 = arith.divf %57, %60 : vector<8x16xf32>
    %62 = arith.truncf %61 : vector<8x16xf32> to vector<8x16xbf16>
    %63 = vector.extract_strided_slice %11 {offsets = [0, 256], sizes = [16, 128], strides = [1, 1]} : vector<16x512xbf16> to vector<16x128xbf16>
    %cst_27 = arith.constant dense<0.000000e+00> : vector<8x128xf32>
    %64 = tpu.matmul %62, %63, %cst_27 {dimension_numbers = #tpu.dot_dimension_numbers<[1], [0], [0], [1], [0, 0, 1, 1], [], []>} : vector<8x16xbf16>, vector<16x128xbf16>, vector<8x128xf32> -> vector<8x128xf32>
    %65 = arith.truncf %64 : vector<8x128xf32> to vector<8x128xbf16>
    %66 = vector.extract_strided_slice %5 {offsets = [0, 384], sizes = [8, 128], strides = [1, 1]} : vector<8x512xbf16> to vector<8x128xbf16>
    %67 = vector.extract_strided_slice %8 {offsets = [384, 0], sizes = [128, 16], strides = [1, 1]} : vector<512x16xbf16> to vector<128x16xbf16>
    %cst_28 = arith.constant dense<0.000000e+00> : vector<8x16xf32>
    %68 = tpu.matmul %66, %67, %cst_28 {dimension_numbers = #tpu.dot_dimension_numbers<[1], [0], [0], [1], [0, 0, 1, 1], [], []>} : vector<8x128xbf16>, vector<128x16xbf16>, vector<8x16xf32> -> vector<8x16xf32>
    %cst_29 = arith.constant 0.0883883461 : f32
    %69 = vector.broadcast %cst_29 : f32 to vector<8x16xf32>
    %70 = arith.mulf %68, %69 : vector<8x16xf32>
    %cst_30 = arith.constant dense<0xFF800000> : vector<8xf32>
    %71 = vector.multi_reduction <maximumf>, %70, %cst_30 [1] : vector<8x16xf32> to vector<8xf32>
    %72 = vector.shape_cast %71 : vector<8xf32> to vector<8x1xf32>
    %73 = vector.broadcast %72 : vector<8x1xf32> to vector<8x16xf32>
    %74 = arith.subf %70, %73 : vector<8x16xf32>
    %75 = math.exp %74 : vector<8x16xf32>
    %cst_31 = arith.constant dense<0.000000e+00> : vector<8xf32>
    %76 = vector.multi_reduction <add>, %75, %cst_31 [1] : vector<8x16xf32> to vector<8xf32>
    %77 = vector.shape_cast %76 : vector<8xf32> to vector<8x1xf32>
    %78 = vector.broadcast %77 : vector<8x1xf32> to vector<8x16xf32>
    %79 = arith.divf %75, %78 : vector<8x16xf32>
    %80 = arith.truncf %79 : vector<8x16xf32> to vector<8x16xbf16>
    %81 = vector.extract_strided_slice %11 {offsets = [0, 384], sizes = [16, 128], strides = [1, 1]} : vector<16x512xbf16> to vector<16x128xbf16>
    %cst_32 = arith.constant dense<0.000000e+00> : vector<8x128xf32>
    %82 = tpu.matmul %80, %81, %cst_32 {dimension_numbers = #tpu.dot_dimension_numbers<[1], [0], [0], [1], [0, 0, 1, 1], [], []>} : vector<8x16xbf16>, vector<16x128xbf16>, vector<8x128xf32> -> vector<8x128xf32>
    %83 = arith.truncf %82 : vector<8x128xf32> to vector<8x128xbf16>
    %84 = tpu.concatenate %29, %47, %65, %83 in 1 : vector<8x128xbf16>, vector<8x128xbf16>, vector<8x128xbf16>, vector<8x128xbf16> -> vector<8x512xbf16>
    %c0_33 = arith.constant 0 : index
    %c0_34 = arith.constant 0 : index
    %85 = vector.load %arg7[%c0_33, %c0_34] : memref<512x128xbf16, #tpu.memory_space<vmem>>, vector<512x128xbf16>
    %cst_35 = arith.constant dense<0.000000e+00> : vector<8x128xf32>
    %86 = tpu.matmul %84, %85, %cst_35 {dimension_numbers = #tpu.dot_dimension_numbers<[1], [0], [0], [1], [0, 0, 1, 1], [], []>} : vector<8x512xbf16>, vector<512x128xbf16>, vector<8x128xf32> -> vector<8x128xf32>
    %c0_36 = arith.constant 0 : index
    %c0_37 = arith.constant 0 : index
    %87 = vector.load %arg8[%c0_36, %c0_37] : memref<1x128xf32, #tpu.memory_space<vmem>>, vector<1x128xf32>
    %88 = vector.broadcast %87 : vector<1x128xf32> to vector<8x128xf32>
    %89 = arith.addf %86, %88 : vector<8x128xf32>
    %c0_38 = arith.constant 0 : index
    %c0_39 = arith.constant 0 : index
    %90 = vector.load %arg9[%c0_38, %c0_39] : memref<1x128xf32, #tpu.memory_space<vmem>>, vector<1x128xf32>
    %c0_40 = arith.constant 0 : index
    %c0_41 = arith.constant 0 : index
    %91 = vector.load %arg10[%c0_40, %c0_41] : memref<1x128xf32, #tpu.memory_space<vmem>>, vector<1x128xf32>
    %cst_42 = arith.constant dense<0.000000e+00> : vector<8xf32>
    %92 = vector.multi_reduction <add>, %89, %cst_42 [1] : vector<8x128xf32> to vector<8xf32>
    %93 = vector.shape_cast %92 : vector<8xf32> to vector<8x1xf32>
    %cst_43 = arith.constant 1.280000e+02 : f32
    %94 = vector.broadcast %cst_43 : f32 to vector<8x1xf32>
    %95 = arith.divf %93, %94 : vector<8x1xf32>
    %96 = vector.broadcast %95 : vector<8x1xf32> to vector<8x128xf32>
    %97 = arith.subf %89, %96 : vector<8x128xf32>
    %98 = arith.mulf %97, %97 : vector<8x128xf32>
    %cst_44 = arith.constant dense<0.000000e+00> : vector<8xf32>
    %99 = vector.multi_reduction <add>, %98, %cst_44 [1] : vector<8x128xf32> to vector<8xf32>
    %100 = vector.shape_cast %99 : vector<8xf32> to vector<8x1xf32>
    %cst_45 = arith.constant 1.280000e+02 : f32
    %101 = vector.broadcast %cst_45 : f32 to vector<8x1xf32>
    %102 = arith.divf %100, %101 : vector<8x1xf32>
    %cst_46 = arith.constant 9.99999974E-6 : f32
    %103 = vector.broadcast %cst_46 : f32 to vector<8x1xf32>
    %104 = arith.addf %102, %103 : vector<8x1xf32>
    %105 = math.rsqrt %104 : vector<8x1xf32>
    %106 = vector.broadcast %105 : vector<8x1xf32> to vector<8x128xf32>
    %107 = arith.mulf %97, %106 : vector<8x128xf32>
    %108 = vector.broadcast %90 : vector<1x128xf32> to vector<8x128xf32>
    %109 = arith.mulf %107, %108 : vector<8x128xf32>
    %110 = vector.broadcast %91 : vector<1x128xf32> to vector<8x128xf32>
    %111 = arith.addf %109, %110 : vector<8x128xf32>
    %112 = arith.truncf %111 : vector<8x128xf32> to vector<8x128xbf16>
    %c0_47 = arith.constant 0 : index
    %c0_48 = arith.constant 0 : index
    %113 = vector.load %arg11[%c0_47, %c0_48] : memref<128x128xbf16, #tpu.memory_space<vmem>>, vector<128x128xbf16>
    %cst_49 = arith.constant dense<0.000000e+00> : vector<8x128xf32>
    %114 = tpu.matmul %112, %113, %cst_49 {dimension_numbers = #tpu.dot_dimension_numbers<[1], [0], [0], [1], [0, 0, 1, 1], [], []>} : vector<8x128xbf16>, vector<128x128xbf16>, vector<8x128xf32> -> vector<8x128xf32>
    %c0_50 = arith.constant 0 : index
    %c0_51 = arith.constant 0 : index
    %115 = vector.load %arg12[%c0_50, %c0_51] : memref<1x128xf32, #tpu.memory_space<vmem>>, vector<1x128xf32>
    %116 = vector.broadcast %115 : vector<1x128xf32> to vector<8x128xf32>
    %117 = arith.addf %114, %116 : vector<8x128xf32>
    %cst_52 = arith.constant 0.000000e+00 : f32
    %118 = vector.broadcast %cst_52 : f32 to vector<8x128xf32>
    %119 = arith.maximumf %117, %118 : vector<8x128xf32>
    %120 = arith.truncf %119 : vector<8x128xf32> to vector<8x128xbf16>
    %c0_53 = arith.constant 0 : index
    %c0_54 = arith.constant 0 : index
    %121 = vector.load %arg13[%c0_53, %c0_54] : memref<128x128xbf16, #tpu.memory_space<vmem>>, vector<128x128xbf16>
    %cst_55 = arith.constant dense<0.000000e+00> : vector<8x128xf32>
    %122 = tpu.matmul %120, %121, %cst_55 {dimension_numbers = #tpu.dot_dimension_numbers<[1], [0], [0], [1], [0, 0, 1, 1], [], []>} : vector<8x128xbf16>, vector<128x128xbf16>, vector<8x128xf32> -> vector<8x128xf32>
    %c0_56 = arith.constant 0 : index
    %c0_57 = arith.constant 0 : index
    %123 = vector.load %arg14[%c0_56, %c0_57] : memref<1x128xf32, #tpu.memory_space<vmem>>, vector<1x128xf32>
    %124 = vector.broadcast %123 : vector<1x128xf32> to vector<8x128xf32>
    %125 = arith.addf %122, %124 : vector<8x128xf32>
    %126 = arith.addf %125, %111 : vector<8x128xf32>
    %c0_58 = arith.constant 0 : index
    %c0_59 = arith.constant 0 : index
    %127 = vector.load %arg15[%c0_58, %c0_59] : memref<1x128xf32, #tpu.memory_space<vmem>>, vector<1x128xf32>
    %c0_60 = arith.constant 0 : index
    %c0_61 = arith.constant 0 : index
    %128 = vector.load %arg16[%c0_60, %c0_61] : memref<1x128xf32, #tpu.memory_space<vmem>>, vector<1x128xf32>
    %cst_62 = arith.constant dense<0.000000e+00> : vector<8xf32>
    %129 = vector.multi_reduction <add>, %126, %cst_62 [1] : vector<8x128xf32> to vector<8xf32>
    %130 = vector.shape_cast %129 : vector<8xf32> to vector<8x1xf32>
    %cst_63 = arith.constant 1.280000e+02 : f32
    %131 = vector.broadcast %cst_63 : f32 to vector<8x1xf32>
    %132 = arith.divf %130, %131 : vector<8x1xf32>
    %133 = vector.broadcast %132 : vector<8x1xf32> to vector<8x128xf32>
    %134 = arith.subf %126, %133 : vector<8x128xf32>
    %135 = arith.mulf %134, %134 : vector<8x128xf32>
    %cst_64 = arith.constant dense<0.000000e+00> : vector<8xf32>
    %136 = vector.multi_reduction <add>, %135, %cst_64 [1] : vector<8x128xf32> to vector<8xf32>
    %137 = vector.shape_cast %136 : vector<8xf32> to vector<8x1xf32>
    %cst_65 = arith.constant 1.280000e+02 : f32
    %138 = vector.broadcast %cst_65 : f32 to vector<8x1xf32>
    %139 = arith.divf %137, %138 : vector<8x1xf32>
    %cst_66 = arith.constant 9.99999974E-6 : f32
    %140 = vector.broadcast %cst_66 : f32 to vector<8x1xf32>
    %141 = arith.addf %139, %140 : vector<8x1xf32>
    %142 = math.rsqrt %141 : vector<8x1xf32>
    %143 = vector.broadcast %142 : vector<8x1xf32> to vector<8x128xf32>
    %144 = arith.mulf %134, %143 : vector<8x128xf32>
    %145 = vector.broadcast %127 : vector<1x128xf32> to vector<8x128xf32>
    %146 = arith.mulf %144, %145 : vector<8x128xf32>
    %147 = vector.broadcast %128 : vector<1x128xf32> to vector<8x128xf32>
    %148 = arith.addf %146, %147 : vector<8x128xf32>
    %149 = arith.truncf %148 : vector<8x128xf32> to vector<8x128xbf16>
    %c0_67 = arith.constant 0 : index
    %c0_68 = arith.constant 0 : index
    %150 = vector.load %arg17[%c0_67, %c0_68] : memref<8x128xbf16, #tpu.memory_space<vmem>>, vector<8x128xbf16>
    tpu.vector_store %arg17[%c0_67, %c0_68], %149 {strides = array<i32>} : memref<8x128xbf16, #tpu.memory_space<vmem>>, vector<8x128xbf16>,
    return
  }
  func.func @transform_0(%arg0: i32) -> (i32, i32) {
    %c0_i32 = arith.constant 0 : i32
    %c0_i32_0 = arith.constant 0 : i32
    %c0_i32_1 = arith.constant 0 : i32
    return %c0_i32, %c0_i32_0 : i32, i32
  }
  func.func @transform_1(%arg0: i32) -> (i32, i32) {
    %c0_i32 = arith.constant 0 : i32
    %c0_i32_0 = arith.constant 0 : i32
    %c0_i32_1 = arith.constant 0 : i32
    return %c0_i32, %c0_i32_0 : i32, i32
  }
  func.func @transform_2(%arg0: i32) -> (i32, i32) {
    %c0_i32 = arith.constant 0 : i32
    %c0_i32_0 = arith.constant 0 : i32
    %c0_i32_1 = arith.constant 0 : i32
    return %c0_i32, %c0_i32_0 : i32, i32
  }
  func.func @transform_3(%arg0: i32) -> (i32, i32) {
    %c0_i32 = arith.constant 0 : i32
    %c0_i32_0 = arith.constant 0 : i32
    %c0_i32_1 = arith.constant 0 : i32
    return %c0_i32, %c0_i32_0 : i32, i32
  }
  func.func @transform_4(%arg0: i32) -> (i32, i32) {
    %c0_i32 = arith.constant 0 : i32
    %c0_i32_0 = arith.constant 0 : i32
    %c0_i32_1 = arith.constant 0 : i32
    return %c0_i32, %c0_i32_0 : i32, i32
  }
  func.func @transform_5(%arg0: i32) -> (i32, i32) {
    %c0_i32 = arith.constant 0 : i32
    %c0_i32_0 = arith.constant 0 : i32
    %c0_i32_1 = arith.constant 0 : i32
    return %c0_i32, %c0_i32_0 : i32, i32
  }
  func.func @transform_6(%arg0: i32) -> (i32, i32) {
    %c0_i32 = arith.constant 0 : i32
    %c0_i32_0 = arith.constant 0 : i32
    %c0_i32_1 = arith.constant 0 : i32
    return %c0_i32, %c0_i32_0 : i32, i32
  }
  func.func @transform_7(%arg0: i32) -> (i32, i32) {
    %c0_i32 = arith.constant 0 : i32
    %c0_i32_0 = arith.constant 0 : i32
    %c0_i32_1 = arith.constant 0 : i32
    return %c0_i32, %c0_i32_0 : i32, i32
  }
  func.func @transform_8(%arg0: i32) -> (i32, i32) {
    %c0_i32 = arith.constant 0 : i32
    %c0_i32_0 = arith.constant 0 : i32
    %c0_i32_1 = arith.constant 0 : i32
    return %c0_i32, %c0_i32_0 : i32, i32
  }
  func.func @transform_9(%arg0: i32) -> (i32, i32) {
    %c0_i32 = arith.constant 0 : i32
    %c0_i32_0 = arith.constant 0 : i32
    %c0_i32_1 = arith.constant 0 : i32
    return %c0_i32, %c0_i32_0 : i32, i32
  }
  func.func @transform_10(%arg0: i32) -> (i32, i32) {
    %c0_i32 = arith.constant 0 : i32
    %c0_i32_0 = arith.constant 0 : i32
    %c0_i32_1 = arith.constant 0 : i32
    return %c0_i32, %c0_i32_0 : i32, i32
  }
  func.func @transform_11(%arg0: i32) -> (i32, i32) {
    %c0_i32 = arith.constant 0 : i32
    %c0_i32_0 = arith.constant 0 : i32
    %c0_i32_1 = arith.constant 0 : i32
    return %c0_i32, %c0_i32_0 : i32, i32
  }
  func.func @transform_12(%arg0: i32) -> (i32, i32) {
    %c0_i32 = arith.constant 0 : i32
    %c0_i32_0 = arith.constant 0 : i32
    %c0_i32_1 = arith.constant 0 : i32
    return %c0_i32, %c0_i32_0 : i32, i32
  }
  func.func @transform_13(%arg0: i32) -> (i32, i32) {
    %c0_i32 = arith.constant 0 : i32
    %c0_i32_0 = arith.constant 0 : i32
    %c0_i32_1 = arith.constant 0 : i32
    return %c0_i32, %c0_i32_0 : i32, i32
  }
  func.func @transform_14(%arg0: i32) -> (i32, i32) {
    %c0_i32 = arith.constant 0 : i32
    %c0_i32_0 = arith.constant 0 : i32
    %c0_i32_1 = arith.constant 0 : i32
    return %c0_i32, %c0_i32_0 : i32, i32
  }
  func.func @transform_15(%arg0: i32) -> (i32, i32) {
    %c0_i32 = arith.constant 0 : i32
    %c0_i32_0 = arith.constant 0 : i32
    %c0_i32_1 = arith.constant 0 : i32
    return %c0_i32, %c0_i32_0 : i32, i32
  }
  func.func @transform_16(%arg0: i32) -> (i32, i32) {
    %c0_i32 = arith.constant 0 : i32
    %c0_i32_0 = arith.constant 0 : i32
    %c0_i32_1 = arith.constant 0 : i32
    return %c0_i32, %c0_i32_0 : i32, i32
  }
}

</mosaic_0001>

<bundles_post_ra>
// kernel: tpu_custom_call.1
= control target key start
LH: loop header
LB: loop body
LE: loop exit
PB: predicated region body
PF: predicated region fallthrough
CT: control target
= control target key end

     0   :  { %s3776_s0 = inlined_call_operand.vmem [shape: bf16[16,64], index: 0, kind: input, shape index: {}]   ;;  %s3777_s1 = inlined_call_operand.vmem [shape: bf16[64,16], index: 1, kind: input, shape index: {}]   ;;  %s3778_s2 = inlined_call_operand.vmem [shape: bf16[8,128], index: 2, kind: input, shape index: {}]   ;;  %s3779_s3 = inlined_call_operand.vmem [shape: bf16[128,512], index: 3, kind: input, shape index: {}]   ;;  %s3780_s4 = inlined_call_operand.vmem [shape: bf16[512,64], index: 4, kind: input, shape index: {}]   ;;  %s3781_s5 = inlined_call_operand.vmem [shape: bf16[64,512], index: 5, kind: input, shape index: {}]   ;;  %s3782_s6 = inlined_call_operand.hbm [shape: bf16[512,128], index: 6, kind: input, shape index: {}]   ;;  %s3783_s7 = inlined_call_operand.vmem [shape: f32[1,128], index: 7, kind: input, shape index: {}]   ;;  %s3784_s8 = inlined_call_operand.vmem [shape: f32[1,128], index: 8, kind: input, shape index: {}]   ;;  %s3785_s9 = inlined_call_operand.vmem [shape: f32[1,128], index: 9, kind: input, shape index: {}]   ;;  %s3786_s10 = inlined_call_operand.hbm [shape: bf16[128,128], index: 10, kind: input, shape index: {}]   ;;  %s3787_s11 = inlined_call_operand.vmem [shape: f32[1,128], index: 11, kind: input, shape index: {}]   ;;  %s3788_s12 = inlined_call_operand.hbm [shape: bf16[128,128], index: 12, kind: input, shape index: {}]   ;;  %s3789_s13 = inlined_call_operand.vmem [shape: f32[1,128], index: 13, kind: input, shape index: {}]   ;;  %s3790_s14 = inlined_call_operand.vmem [shape: f32[1,128], index: 14, kind: input, shape index: {}]   ;;  %s3791_s15 = inlined_call_operand.vmem [shape: f32[1,128], index: 15, kind: input, shape index: {}]   ;;  %s3792_s16 = inlined_call_operand.hbm [shape: bf16[8,128], index: 16, kind: output, shape index: {}]  }
   0x1   :  { %3793 = sst [smem:[#allocation12_spill]] %s3776_s0 }
   0x2   :  { %21 = vsyncpa [#allocation3], 0 }
   0x3   :  { %22 = vsyncpa [#allocation6], 0 }
   0x4   :  { %23 = vsyncpa [#allocation4], 0  ;;  %s59_s23 = sshll.u32 %s3786_s10, 4  ;;  %s2966_s24 = smov [#allocation5]   ;;  %s60_s23 = int_to_ptr.hbm [resolvable:$true] %s59_s23 }
   0x5   :  { %s61_s25 = sshll.u32 %s2966_s24, 4  ;;  %s40_s28 = sshll.u32 %s3782_s6, 4  ;;  %s62_s25 = int_to_ptr.vmem [resolvable:$true] %s61_s25  ;;  %s41_s28 = int_to_ptr.hbm [resolvable:$true] %s40_s28 }
   0x6   :  { %s2967_s29 = smov 64   ;;  %s2968_s30 = smov 4  }
   0x7   :  { %67 = dma.hbm_to_vmem [thread:$0]  %s60_s23, 1024, %s62_s25, [#allocation6], %s2967_s29, %s2967_s29, %s2968_s30  }
   0x8   :  { %s2969_s0 = smov [#allocation2]   ;;  %s74_s20 = sshll.u32 %s3788_s12, 4  ;;  %s75_s20 = int_to_ptr.hbm [resolvable:$true] %s74_s20 }
   0x9   :  { %s42_s17 = sshll.u32 %s2969_s0, 4  ;;  %s2970_s10 = smov [#allocation7]   ;;  %s43_s17 = int_to_ptr.vmem [resolvable:$true] %s42_s17 }
   0xa   :  { %48 = dma.hbm_to_vmem [thread:$0]  %s41_s28, 4096, %s43_s17, [#allocation3], %s2967_s29, %s2967_s29, %s2968_s30  }
   0xb   :  { %s76_s21 = sshll.u32 %s2970_s10, 4  ;;  %s77_s21 = int_to_ptr.vmem [resolvable:$true] %s76_s21 }
   0xc   :  { %82 = dma.hbm_to_vmem [thread:$0]  %s75_s20, 1024, %s77_s21, [#allocation6], %s2967_s29, %s2967_s29, %s2968_s30  }
   0xd   :  { %2960 = dma.done.wait [#allocation3], 4096  }
   0xe   :  { %2961 = vsyncadd [#allocation3], 4294963200 }
   0xf   :  { %2962 = dma.done.wait [#allocation6], 2048  }
  0x10   :  { %2963 = vsyncadd [#allocation6], 4294965248  ;;  %v2225_v0 = vld [vmem:[%s3779_s3 + $0xe0] sm:$0xf]  ;;  %v2718_v1 = vld [vmem:[%s3779_s3 + $0xec] sm:$0xf0] }
  0x11   :  { %v2716_v2 = vld [vmem:[%s3779_s3 + $0xe4] sm:$0xf]  ;;  %v2226_v3 = vor.u32 %v2718_v1, %v2225_v0  ;;  %v2227_v4 = vld [vmem:[%s3779_s3 + $0xf0] sm:$0xf0]  ;;  %v2209_v5 = vld [vmem:[%s3779_s3 + $0xc0] sm:$0xf] }
  0x12   :  { %v2714_v6 = vld [vmem:[%s3779_s3 + $0xcc] sm:$0xf0]  ;;  %v2230_v7 = vor.u32 %v2716_v2, %v2227_v4  ;;  %v2712_v8 = vld [vmem:[%s3779_s3 + $0xc4] sm:$0xf]  ;;  %v2211_v9 = vld [vmem:[%s3779_s3 + $0xd0] sm:$0xf0] }
  0x13   :  { %305 = vmatpush.bf16.msra.mxu0 %v2226_v3  ;;  %v2210_v10 = vor.u32 %v2714_v6, %v2209_v5  ;;  %v2214_v11 = vor.u32 %v2712_v8, %v2211_v9  ;;  %v2193_v12 = vld [vmem:[%s3779_s3 + $0xa0] sm:$0xf]  ;;  %v2710_v13 = vld [vmem:[%s3779_s3 + $0xac] sm:$0xf0]  ;;  %v2708_v14 = vld [vmem:[%s3779_s3 + $0xa4] sm:$0xf] }
  0x14   :  { %318 = vmatpush.bf16.msra.mxu1 %v2230_v7  ;;  %v2195_v15 = vld [vmem:[%s3779_s3 + $0xb0] sm:$0xf0]  ;;  %v2194_v16 = vor.u32 %v2710_v13, %v2193_v12  ;;  %v2177_v18 = vld [vmem:[%s3779_s3 + $0x80] sm:$0xf]  ;;  %v2706_v19 = vld [vmem:[%s3779_s3 + $0x8c] sm:$0xf0] }
  0x15   :  { %v2198_v17 = vor.u32 %v2708_v14, %v2195_v15  ;;  %v2704_v20 = vld [vmem:[%s3779_s3 + $0x84] sm:$0xf]  ;;  %v2179_v21 = vld [vmem:[%s3779_s3 + $0x90] sm:$0xf0]  ;;  %v2178_v22 = vor.u32 %v2706_v19, %v2177_v18  ;;  %v2161_v23 = vld [vmem:[%s3779_s3 + $0x60] sm:$0xf] }
  0x16   :  { %v2702_v24 = vld [vmem:[%s3779_s3 + $0x6c] sm:$0xf0]  ;;  %v2182_v25 = vor.u32 %v2704_v20, %v2179_v21  ;;  %v2700_v26 = vld [vmem:[%s3779_s3 + $0x64] sm:$0xf]  ;;  %v2163_v27 = vld [vmem:[%s3779_s3 + $0x70] sm:$0xf0] }
  0x17   :  { %306 = vmatpush.bf16.msra.mxu0 %v2210_v10  ;;  %v2162_v28 = vor.u32 %v2702_v24, %v2161_v23  ;;  %v2166_v29 = vor.u32 %v2700_v26, %v2163_v27  ;;  %v2145_v30 = vld [vmem:[%s3779_s3 + $0x40] sm:$0xf]  ;;  %v2698_v31 = vld [vmem:[%s3779_s3 + $0x4c] sm:$0xf0]  ;;  %v2696_v32 = vld [vmem:[%s3779_s3 + $0x44] sm:$0xf] }
  0x18   :  { %319 = vmatpush.bf16.msra.mxu1 %v2214_v11  ;;  %v2147_v33 = vld [vmem:[%s3779_s3 + $0x50] sm:$0xf0]  ;;  %v2146_v34 = vor.u32 %v2698_v31, %v2145_v30  ;;  %v2129_v36 = vld [vmem:[%s3779_s3 + $0x20] sm:$0xf]  ;;  %v2694_v37 = vld [vmem:[%s3779_s3 + $0x2c] sm:$0xf0] }
  0x19   :  { %v2150_v35 = vor.u32 %v2696_v32, %v2147_v33  ;;  %v2692_v38 = vld [vmem:[%s3779_s3 + $0x24] sm:$0xf]  ;;  %v2131_v39 = vld [vmem:[%s3779_s3 + $0x30] sm:$0xf0]  ;;  %v2130_v40 = vor.u32 %v2694_v37, %v2129_v36  ;;  %v2113_v42 = vld [vmem:[%s3779_s3] sm:$0xf] }
  0x1a   :  { %v2134_v41 = vor.u32 %v2692_v38, %v2131_v39  ;;  %v2690_v43 = vld [vmem:[%s3779_s3 + $0xc] sm:$0xf0]  ;;  %v2688_v44 = vld [vmem:[%s3779_s3 + $0x4] sm:$0xf]  ;;  %v2115_v45 = vld [vmem:[%s3779_s3 + $0x10] sm:$0xf0] }
  0x1b   :  { %307 = vmatpush.bf16.msra.mxu0 %v2194_v16  ;;  %v2114_v46 = vor.u32 %v2690_v43, %v2113_v42  ;;  %v2118_v47 = vor.u32 %v2688_v44, %v2115_v45  ;;  %v3166_v48 = vld [vmem:[%s3777_s1 + $0x18] sm:$0xff]  ;;  %v3171_v49 = vld [vmem:[%s3778_s2] sm:$0xf]  ;;  %v3177_v50 = vld [vmem:[%s3777_s1 + $0x10] sm:$0xff]  ;;  %vm607_vm0 = vcmask 523264   ;;  %s3794_s12 = sld [smem:[#allocation12_spill]] }
  0x1c   :  { %320 = vmatpush.bf16.msra.mxu1 %v2198_v17  ;;  %v3186_v51 = vld [vmem:[%s3777_s1 + $0x8] sm:$0xff]  ;;  %v3193_v52 = vld [vmem:[%s3777_s1] sm:$0xff]  ;;  %v2719_v55 = vld [vmem:[%s3779_s3 + $0xf4] sm:$0xf0]  ;;  %vm1163_vm1 = vcmask 130048   ;;  %s2972_s20 = smov [#allocation8]  }
  0x1d   :  { %v2720_v53 = vld [vmem:[%s3780_s4] sm:$0xff]  ;;  %v2233_v54 = vld [vmem:[%s3779_s3 + $0xe8] sm:$0xf]  ;;  %v2715_v58 = vld [vmem:[%s3779_s3 + $0xd4] sm:$0xf0]  ;;  %s2100_s2 = sshll.u32 %s3792_s16, 4  ;;  %s2101_s2 = int_to_ptr.hbm [resolvable:$true] %s2100_s2 }
  0x1e   :  { %v2217_v56 = vld [vmem:[%s3779_s3 + $0xc8] sm:$0xf]  ;;  %v2234_v57 = vor.u32 %v2719_v55, %v2233_v54  ;;  %v2711_v61 = vld [vmem:[%s3779_s3 + $0xb4] sm:$0xf0]  ;;  %v2722_v12 = vld [vmem:[%s3780_s4 + $0x10] sm:$0xff] }
  0x1f   :  { %308 = vmatpush.bf16.msra.mxu0 %v2178_v22  ;;  %v2218_v59 = vor.u32 %v2715_v58, %v2217_v56  ;;  %v2201_v60 = vld [vmem:[%s3779_s3 + $0xa8] sm:$0xf]  ;;  %v2707_v1 = vld [vmem:[%s3779_s3 + $0x94] sm:$0xf0]  ;;  %v2740_v18 = vld [vmem:[%s3780_s4 + $0xa0] sm:$0xff] }
  0x20   :  { %321 = vmatpush.bf16.msra.mxu1 %v2182_v25  ;;  %331 = vmatpush.bf16.msra.mxu2 %v2234_v57  ;;  %v2202_v62 = vor.u32 %v2711_v61, %v2201_v60  ;;  %v2721_v63 = vld [vmem:[%s3780_s4 + $0x8] sm:$0xff]  ;;  %v2703_v4 = vld [vmem:[%s3779_s3 + $0x74] sm:$0xf0]  ;;  %v2724_v19 = vld [vmem:[%s3780_s4 + $0x20] sm:$0xff] }
  0x21   :  { %v2185_v0 = vld [vmem:[%s3779_s3 + $0x88] sm:$0xf]  ;;  %v2699_v7 = vld [vmem:[%s3779_s3 + $0x54] sm:$0xf0]  ;;  %v2736_v22 = vld [vmem:[%s3780_s4 + $0x80] sm:$0xff] }
  0x22   :  { %v2169_v2 = vld [vmem:[%s3779_s3 + $0x68] sm:$0xf]  ;;  %v2186_v3 = vor.u32 %v2707_v1, %v2185_v0  ;;  %v2695_v10 = vld [vmem:[%s3779_s3 + $0x34] sm:$0xf0]  ;;  %v2717_v23 = vld [vmem:[%s3779_s3 + $0xec] sm:$0xf] }
  0x23   :  { %309 = vmatpush.bf16.msra.mxu0 %v2162_v28  ;;  %v2170_v5 = vor.u32 %v2703_v4, %v2169_v2  ;;  %v2153_v6 = vld [vmem:[%s3779_s3 + $0x48] sm:$0xf]  ;;  %v2691_v14 = vld [vmem:[%s3779_s3 + $0x14] sm:$0xf0]  ;;  %v2235_v24 = vld [vmem:[%s3779_s3 + $0xf8] sm:$0xf0] }
  0x24   :  { %322 = vmatpush.bf16.msra.mxu1 %v2166_v29  ;;  %332 = vmatpush.bf16.msra.mxu2 %v2218_v59  ;;  %v2154_v8 = vor.u32 %v2699_v7, %v2153_v6  ;;  %v2137_v9 = vld [vmem:[%s3779_s3 + $0x28] sm:$0xf]  ;;  %v2723_v16 = vld [vmem:[%s3780_s4 + $0x18] sm:$0xff]  ;;  %v2238_v25 = vor.u32 %v2717_v23, %v2235_v24  ;;  %v2713_v26 = vld [vmem:[%s3779_s3 + $0xcc] sm:$0xf] }
  0x25   :  { %v2138_v11 = vor.u32 %v2695_v10, %v2137_v9  ;;  %v2121_v13 = vld [vmem:[%s3779_s3 + $0x8] sm:$0xf]  ;;  %v2735_v17 = vld [vmem:[%s3780_s4 + $0x78] sm:$0xff]  ;;  %v2709_v29 = vld [vmem:[%s3779_s3 + $0xac] sm:$0xf] }
  0x26   :  { %v2122_v15 = vor.u32 %v2691_v14, %v2121_v13  ;;  %v2741_v20 = vld [vmem:[%s3780_s4 + $0xa8] sm:$0xff]  ;;  %344 = vmatpush.bf16.msra.mxu3 %v2238_v25  ;;  %v2219_v27 = vld [vmem:[%s3779_s3 + $0xd8] sm:$0xf0]  ;;  %v2742_v31 = vld [vmem:[%s3780_s4 + $0xb0] sm:$0xff] }
  0x27   :  { %310 = vmatpush.bf16.msra.mxu0 %v2146_v34  ;;  %v2725_v21 = vld [vmem:[%s3780_s4 + $0x28] sm:$0xff]  ;;  %v2222_v28 = vor.u32 %v2713_v26, %v2219_v27  ;;  %v2203_v30 = vld [vmem:[%s3779_s3 + $0xb8] sm:$0xf0]  ;;  %v2726_v36 = vld [vmem:[%s3780_s4 + $0x30] sm:$0xff] }
  0x28   :  { %323 = vmatpush.bf16.msra.mxu1 %v2150_v35  ;;  %333 = vmatpush.bf16.msra.mxu2 %v2202_v62  ;;  %v2206_v32 = vor.u32 %v2709_v29, %v2203_v30  ;;  %v2705_v33 = vld [vmem:[%s3779_s3 + $0x8c] sm:$0xf]  ;;  %v2187_v34 = vld [vmem:[%s3779_s3 + $0x98] sm:$0xf0]  ;;  %v2738_v57 = vld [vmem:[%s3780_s4 + $0x90] sm:$0xff] }
  0x29   :  { %v2190_v35 = vor.u32 %v2705_v33, %v2187_v34  ;;  %v2737_v37 = vld [vmem:[%s3780_s4 + $0x88] sm:$0xff]  ;;  %v2171_v39 = vld [vmem:[%s3779_s3 + $0x78] sm:$0xf0]  ;;  %v2730_v13 = vld [vmem:[%s3780_s4 + $0x50] sm:$0xff] }
  0x2a   :  { %345 = vmatpush.bf16.msra.mxu3 %v2222_v28  ;;  %v2701_v38 = vld [vmem:[%s3779_s3 + $0x6c] sm:$0xf]  ;;  %v2155_v42 = vld [vmem:[%s3779_s3 + $0x58] sm:$0xf0]  ;;  %v2732_v33 = vld [vmem:[%s3780_s4 + $0x60] sm:$0xff] }
  0x2b   :  { %311 = vmatpush.bf16.msra.mxu0 %v2130_v40  ;;  %v2174_v40 = vor.u32 %v2701_v38, %v2171_v39  ;;  %v2693_v44 = vld [vmem:[%s3779_s3 + $0x2c] sm:$0xf]  ;;  %v2139_v45 = vld [vmem:[%s3779_s3 + $0x38] sm:$0xf0] }
  0x2c   :  { %324 = vmatpush.bf16.msra.mxu1 %v2134_v41  ;;  %334 = vmatpush.bf16.msra.mxu2 %v2186_v3  ;;  %v2697_v41 = vld [vmem:[%s3779_s3 + $0x4c] sm:$0xf]  ;;  %v2123_v54 = vld [vmem:[%s3779_s3 + $0x18] sm:$0xf0] }
  0x2d   :  { %v2158_v43 = vor.u32 %v2697_v41, %v2155_v42  ;;  %v2727_v56 = vld [vmem:[%s3780_s4 + $0x38] sm:$0xff]  ;;  %v2729_v4 = vld [vmem:[%s3780_s4 + $0x48] sm:$0xff] }
  0x2e   :  { %346 = vmatpush.bf16.msra.mxu3 %v2206_v32  ;;  %v2747_v6 = vld [vmem:[%s3780_s4 + $0xd8] sm:$0xff]  ;;  %v2749_v25 = vld [vmem:[%s3780_s4 + $0xe8] sm:$0xff] }
  0x2f   :  { %312 = vmatpush.bf16.msra.mxu0 %v2114_v46  ;;  %v2142_v46 = vor.u32 %v2693_v44, %v2139_v45  ;;  %v2731_v23 = vld [vmem:[%s3780_s4 + $0x58] sm:$0xff]  ;;  %v2733_v41 = vld [vmem:[%s3780_s4 + $0x68] sm:$0xff]  ;;  %v2764_v44 = vld [vmem:[%s3781_s5 + $0x64] sm:$0xf] }
  0x30   :  { %325 = vmatpush.bf16.msra.mxu1 %v2118_v47  ;;  %335 = vmatpush.bf16.msra.mxu2 %v2170_v5  ;;  %v2743_v47 = vld [vmem:[%s3780_s4 + $0xb8] sm:$0xff]  ;;  %v2471_v45 = vld [vmem:[%s3781_s5 + $0x70] sm:$0xf0] }
  0x32   :  { %313 = vmatmul.bf16.vlgmr.msra.gmra.mxu0 %v3171_v49  ;;  %347 = vmatpush.bf16.msra.mxu3 %v2190_v35  ;;  %v2750_v35 = vld [vmem:[%s3780_s4 + $0xf0] sm:$0xff] }
  0x33   :  { %708 = vmatpush.bf16.msrb.mxu0 %v3166_v48  ;;  %326 = vmatmul.bf16.vlgmr.msra.gmra.mxu1 %v3171_v49 }
  0x34   :  { %2816 = vmatpush.bf16.msrb.mxu1 %v3166_v48  ;;  %336 = vmatpush.bf16.msra.mxu2 %v2154_v8 }
  0x36   :  { %348 = vmatpush.bf16.msra.mxu3 %v2174_v40  ;;  %v2744_v40 = vld [vmem:[%s3780_s4 + $0xc0] sm:$0xff] }
  0x37   :  { %709 = vmatpush.bf16.msrb.mxu0 %v3177_v50 }
  0x38   :  { %2819 = vmatpush.bf16.msrb.mxu1 %v3177_v50  ;;  %337 = vmatpush.bf16.msra.mxu2 %v2138_v11 }
  0x3a   :  { %349 = vmatpush.bf16.msra.mxu3 %v2158_v43  ;;  %v2751_v43 = vld [vmem:[%s3780_s4 + $0xf8] sm:$0xff] }
  0x3b   :  { %710 = vmatpush.bf16.msrb.mxu0 %v3186_v51 }
  0x3c   :  { %2822 = vmatpush.bf16.msrb.mxu1 %v3186_v51  ;;  %338 = vmatpush.bf16.msra.mxu2 %v2122_v15  ;;  %v2748_v15 = vld [vmem:[%s3780_s4 + $0xe0] sm:$0xff] }
  0x3e   :  { %350 = vmatpush.bf16.msra.mxu3 %v2142_v46 }
  0x3f   :  { %711 = vmatpush.bf16.msrb.mxu0 %v3193_v52  ;;  %339 = vmatmul.bf16.vlgmr.msra.gmra.mxu2 %v3171_v49 }
  0x40   :  { %2825 = vmatpush.bf16.msrb.mxu1 %v3193_v52  ;;  %2817 = vmatpush.bf16.msrb.mxu2 %v3166_v48 }
  0x42   :  { %2383 = vmatmul.msk.bf16.vlgmr.msrb.gmra.mxu0 %vm607_vm0, %v2720_v53  ;;  %v2689_v53 = vld [vmem:[%s3779_s3 + $0xc] sm:$0xf]  ;;  %s2098_s3 = sshll.u32 %s2972_s20, 4  ;;  %s2099_s3 = int_to_ptr.vmem [resolvable:$true] %s2098_s3 }
  0x43   :  { %2398 = vmatmul.msk.bf16.vlgmr.msrb.gmra.mxu1 %vm607_vm0, %v2735_v17  ;;  %v2126_v55 = vor.u32 %v2689_v53, %v2123_v54  ;;  %v2760_v53 = vld [vmem:[%s3781_s5 + $0x44] sm:$0xf]  ;;  %v2455_v54 = vld [vmem:[%s3781_s5 + $0x50] sm:$0xf0] }
  0x44   :  { %2820 = vmatpush.bf16.msrb.mxu2 %v3177_v50 }
  0x45   :  { %351 = vmatpush.bf16.msra.mxu3 %v2126_v55  ;;  %v2458_v55 = vor.u32 %v2760_v53, %v2455_v54 }
  0x48   :  { %2823 = vmatpush.bf16.msrb.mxu2 %v3186_v51  ;;  %352 = vmatmul.bf16.vlgmr.msra.gmra.mxu3 %v3171_v49  ;;  %v2746_v49 = vld [vmem:[%s3780_s4 + $0xd0] sm:$0xff] }
  0x49   :  { %2818 = vmatpush.bf16.msrb.mxu3 %v3166_v48  ;;  %v2728_v48 = vld [vmem:[%s3780_s4 + $0x40] sm:$0xff] }
  0x4c   :  { %2826 = vmatpush.bf16.msrb.mxu2 %v3193_v52 }
  0x4d   :  { %2821 = vmatpush.bf16.msrb.mxu3 %v3177_v50 }
  0x4f   :  { %2403 = vmatmul.msk.bf16.vlgmr.msrb.gmra.mxu2 %vm607_vm0, %v2740_v18 }
  0x51   :  { %2824 = vmatpush.bf16.msrb.mxu3 %v3186_v51 }
  0x52   :  { %2384 = vmatmul.msk.bf16.gmra.mxu0 %vm607_vm0, %v2721_v63  ;;  %v2739_v63 = vld [vmem:[%s3780_s4 + $0x98] sm:$0xff] }
  0x53   :  { %2399 = vmatmul.msk.bf16.gmra.mxu1 %vm607_vm0, %v2736_v22 }
  0x55   :  { %2827 = vmatpush.bf16.msrb.mxu3 %v3193_v52 }
  0x58   :  { %2409 = vmatmul.msk.bf16.vlgmr.msrb.gmra.mxu3 %vm607_vm0, %v2746_v49 }
  0x5f   :  { %2404 = vmatmul.msk.bf16.gmra.mxu2 %vm607_vm0, %v2741_v20 }
  0x62   :  { %2385 = vmatmul.msk.bf16.gmra.mxu0 %vm607_vm0, %v2722_v12 }
  0x63   :  { %2400 = vmatmul.msk.bf16.gmra.mxu1 %vm607_vm0, %v2737_v37 }
  0x68   :  { %2410 = vmatmul.msk.bf16.gmra.mxu3 %vm607_vm0, %v2747_v6 }
  0x6f   :  { %2405 = vmatmul.msk.bf16.gmra.mxu2 %vm607_vm0, %v2742_v31 }
  0x72   :  { %2386 = vmatmul.msk.bf16.gmra.mxu0 %vm607_vm0, %v2723_v16 }
  0x73   :  { %2401 = vmatmul.msk.bf16.gmra.mxu1 %vm607_vm0, %v2738_v57 }
  0x78   :  { %2411 = vmatmul.msk.bf16.gmra.mxu3 %vm607_vm0, %v2748_v15 }
  0x7f   :  { %2406 = vmatmul.msk.bf16.gmra.mxu2 %vm607_vm0, %v2743_v47  ;;  %v2474_v47 = vor.u32 %v2764_v44, %v2471_v45 }
  0x81   :  { %1059 = vmatpush.bf16.msra.mxu2 %v2474_v47 }
  0x82   :  { %2387 = vmatmul.msk.bf16.gmra.mxu0 %vm607_vm0, %v2724_v19 }
  0x83   :  { %2402 = vmatmul.msk.bf16.gmra.mxu1 %vm607_vm0, %v2739_v63  ;;  %v2423_v63 = vld [vmem:[%s3781_s5 + $0x10] sm:$0xf0] }
  0x85   :  { %1060 = vmatpush.bf16.msra.mxu2 %v2458_v55 }
  0x88   :  { %2412 = vmatmul.msk.bf16.gmra.mxu3 %vm607_vm0, %v2749_v25 }
  0x8f   :  { %2407 = vmatmul.msk.bf16.gmra.mxu2 %vm607_vm0, %v2744_v40 }
  0x92   :  { %2388 = vmatmul.msk.bf16.gmra.mxu0 %vm607_vm0, %v2725_v21 }
  0x98   :  { %2413 = vmatmul.msk.bf16.gmra.mxu3 %vm607_vm0, %v2750_v35  ;;  %v2766_v35 = vld [vmem:[%s3781_s5 + $0x6c] sm:$0xf0] }
  0xa2   :  { %2389 = vmatmul.msk.bf16.gmra.mxu0 %vm607_vm0, %v2726_v36 }
  0xa8   :  { %2414 = vmatmul.msk.bf16.gmra.mxu3 %vm607_vm0, %v2751_v43 }
  0xaf   :  { %v314_v58 = vpop.f32.mrf.mxu0 }
  0xb0   :  { %v327_v59 = vpop.f32.mrf.mxu1 }
  0xb1   :  { %v3363_v60 = vpack.c.bf16 %v327_v59, %v314_v58  ;;  %v2756_v58 = vld [vmem:[%s3781_s5 + $0x24] sm:$0xf]  ;;  %v2439_v59 = vld [vmem:[%s3781_s5 + $0x30] sm:$0xf0] }
  0xb2   :  { %2390 = vmatmul.msk.bf16.gmra.mxu0 %vm607_vm0, %v2727_v56 }
  0xb7   :  { %v316_v61 = vpop.f32.mrf.mxu0 }
  0xb8   :  { %v329_v62 = vpop.f32.mrf.mxu1  ;;  %v2442_v61 = vor.u32 %v2756_v58, %v2439_v59 }
  0xba   :  { %1061 = vmatpush.bf16.msra.mxu2 %v2442_v61  ;;  %v2762_v61 = vld [vmem:[%s3781_s5 + $0x4c] sm:$0xf0] }
  0xbf   :  { %v713_v0 = vpop.f32.mrf.mxu0 }
  0xc0   :  { %v873_v50 = vpack.c.bf16 %v713_v0, %v713_v0  ;;  %v3442_v36 = vpop.f32.mrf.mxu1  ;;  %v2745_v0 = vld [vmem:[%s3780_s4 + $0xc8] sm:$0xff] }
  0xc1   :  { %2408 = vmatmul.msk.bf16.gmra.mxu2 %vm607_vm0, %v2745_v0 }
  0xc2   :  { %2391 = vmatmul.msk.bf16.gmra.mxu0 %vm607_vm0, %v2728_v48  ;;  %v3382_v1 = vunpack.c.l.b16 %v873_v50  ;;  %v3414_v21 = vpop.f32.mrf.mxu2  ;;  %v2752_v48 = vld [vmem:[%s3781_s5 + $0x4] sm:$0xf]  ;;  %v2734_v50 = vld [vmem:[%s3780_s4 + $0x70] sm:$0xff] }
  0xc3   :  { %v2426_v49 = vor.u32 %v2752_v48, %v2423_v63 }
  0xc5   :  { %1062 = vmatpush.bf16.msra.mxu2 %v2426_v49 }
  0xc7   :  { %v715_v51 = vpop.f32.mrf.mxu0 }
  0xc8   :  { %v874_v52 = vpack.c.bf16 %v715_v51, %v715_v51  ;;  %v3448_v39 = vpop.f32.mrf.mxu1 }
  0xca   :  { %v3384_v2 = vunpack.c.l.b16 %v874_v52  ;;  %v342_v26 = vpop.f32.mrf.mxu2 }
  0xcc   :  { %v1133_v3 = vpack.c.b16 %v3384_v2, %v3382_v1 }
  0xcf   :  { %v718_v5 = vpop.f32.mrf.mxu0 }
  0xd0   :  { %v875_v7 = vpack.c.bf16 %v718_v5, %v718_v5  ;;  %v3478_v56 = vpop.f32.mrf.mxu1 }
  0xd2   :  { %2392 = vmatmul.msk.bf16.gmra.mxu0 %vm607_vm0, %v2729_v4  ;;  %v3396_v10 = vunpack.c.l.b16 %v875_v7  ;;  %v3444_v37 = vpop.f32.mrf.mxu2  ;;  %v3511_v7 = vld [vmem:[%s3794_s12] sm:$0xff] }
  0xd3   :  { %2484 = vmatmul.msk.bf16.vlgmr.msra.gmra.mxu2 %vm607_vm0, %v3511_v7 }
  0xd7   :  { %v720_v8 = vpop.f32.mrf.mxu0 }
  0xd8   :  { %v876_v9 = vpack.c.bf16 %v720_v8, %v720_v8  ;;  %v3501_v52 = vpop.f32.mrf.mxu1 }
  0xda   :  { %v3398_v11 = vunpack.c.l.b16 %v876_v9  ;;  %v3468_v46 = vpop.f32.mrf.mxu2 }
  0xdc   :  { %v1134_v12 = vpack.c.b16 %v3398_v11, %v3396_v10  ;;  %v2753_v10 = vld [vmem:[%s3781_s5 + $0xc] sm:$0xf]  ;;  %v2431_v11 = vld [vmem:[%s3781_s5 + $0x18] sm:$0xf0] }
  0xdf   :  { %v723_v14 = vpop.f32.mrf.mxu0 }
  0xe0   :  { %v877_v16 = vpack.c.bf16 %v723_v14, %v723_v14  ;;  %v3506_v6 = vpop.f32.mrf.mxu1  ;;  %v3519_v14 = vpop.f32.mrf.mxu3 }
  0xe2   :  { %2393 = vmatmul.msk.bf16.gmra.mxu0 %vm607_vm0, %v2730_v13  ;;  %v3410_v19 = vunpack.c.l.b16 %v877_v16  ;;  %v3486_v62 = vpop.f32.mrf.mxu2 }
  0xe7   :  { %v725_v17 = vpop.f32.mrf.mxu0 }
  0xe8   :  { %v878_v18 = vpack.c.bf16 %v725_v17, %v725_v17  ;;  %v3517_v13 = vpop.f32.mrf.mxu1  ;;  %v355_v40 = vpop.f32.mrf.mxu3 }
  0xe9   :  { %v2479_v40 = vld [vmem:[%s3781_s5 + $0x78] sm:$0xf0] }
  0xea   :  { %v3412_v20 = vunpack.c.l.b16 %v878_v18  ;;  %v3504_v4 = vpop.f32.mrf.mxu2 }
  0xec   :  { %v1135_v22 = vpack.c.b16 %v3412_v20, %v3410_v19  ;;  %v2757_v19 = vld [vmem:[%s3781_s5 + $0x2c] sm:$0xf]  ;;  %v2447_v20 = vld [vmem:[%s3781_s5 + $0x38] sm:$0xf0] }
  0xef   :  { %v728_v24 = vpop.f32.mrf.mxu0 }
  0xf0   :  { %v879_v27 = vpack.c.bf16 %v728_v24, %v728_v24  ;;  %v3531_v45 = vpop.f32.mrf.mxu1  ;;  %v3543_v0 = vpop.f32.mrf.mxu3 }
  0xf2   :  { %2394 = vmatmul.msk.bf16.gmra.mxu0 %vm607_vm0, %v2731_v23  ;;  %v3426_v30 = vunpack.c.l.b16 %v879_v27  ;;  %v3513_v8 = vpop.f32.mrf.mxu2 }
  0xf7   :  { %v730_v28 = vpop.f32.mrf.mxu0 }
  0xf8   :  { %v880_v29 = vpack.c.bf16 %v730_v28, %v730_v28 }
  0xfa   :  { %v3428_v31 = vunpack.c.l.b16 %v880_v29  ;;  %v3521_v23 = vpop.f32.mrf.mxu2 }
  0xfc   :  { %v1136_v32 = vpack.c.b16 %v3428_v31, %v3426_v30  ;;  %v2463_v30 = vld [vmem:[%s3781_s5 + $0x58] sm:$0xf0] }
  0xff   :  { %v3435_v34 = vpop.f32.mrf.mxu0 }
 0x102   :  { %2395 = vmatmul.msk.bf16.gmra.mxu0 %vm607_vm0, %v2732_v33  ;;  %v2469_v33 = vld [vmem:[%s3781_s5 + $0x60] sm:$0xf]  ;;  %v828_v59 = vpop.f32.mrf.mxu2 }
 0x107   :  { %v3446_v38 = vpop.f32.mrf.mxu0 }
 0x108   :  { %v882_v53 = vpack.c.bf16 %v3446_v38, %v3446_v38 }
 0x10a   :  { %v1126_v48 = vunpack.c.l.b16 %v882_v53  ;;  %v903_v53 = vpack.c.bf16 %v3442_v36, %v3442_v36  ;;  %v917_v36 = vpack.c.bf16 %v3513_v8, %v3513_v8 }
 0x10f   :  { %v3457_v42 = vpop.f32.mrf.mxu0 }
 0x110   :  { %v883_v43 = vpack.c.bf16 %v3457_v42, %v3457_v42  ;;  %v2453_v42 = vld [vmem:[%s3781_s5 + $0x40] sm:$0xf] }
 0x111   :  { %v2454_v38 = vor.u32 %v2762_v61, %v2453_v42  ;;  %v1246_v42 = vunpack.c.l.b16 %v903_v53 }
 0x112   :  { %2396 = vmatmul.msk.bf16.gmra.mxu0 %vm607_vm0, %v2733_v41  ;;  %v2470_v41 = vor.u32 %v2766_v35, %v2469_v33  ;;  %v1127_v58 = vunpack.c.l.b16 %v883_v43  ;;  %v2765_v35 = vld [vmem:[%s3781_s5 + $0x6c] sm:$0xf]  ;;  %v919_v43 = vpack.c.bf16 %v828_v59, %v828_v59 }
 0x114   :  { %1045 = vmatpush.bf16.msra.mxu1 %v2470_v41  ;;  %v2482_v41 = vor.u32 %v2765_v35, %v2479_v40 }
 0x117   :  { %v740_v57 = vpop.f32.mrf.mxu0 }
 0x118   :  { %v884_v27 = vpack.c.bf16 %v740_v57, %v740_v57  ;;  %v881_v57 = vpack.c.bf16 %v3435_v34, %v3435_v34  ;;  %1046 = vmatpush.bf16.msra.mxu1 %v2454_v38 }
 0x11a   :  { %v1128_v54 = vunpack.c.l.b16 %v884_v27  ;;  %v1125_v49 = vunpack.c.l.b16 %v881_v57  ;;  %v3559_v27 = vpop.f32.mrf.mxu3  ;;  %v1354_v57 = vunpack.c.l.b16 %v919_v43 }
 0x11c   :  { %v1138_v63 = vpack.c.b16 %v1128_v54, %v1127_v58  ;;  %v904_v54 = vpack.c.bf16 %v3448_v39, %v3448_v39  ;;  %v918_v39 = vpack.c.bf16 %v3521_v23, %v3521_v23  ;;  %v2450_v23 = vor.u32 %v2757_v19, %v2447_v20 }
 0x11e   :  { %v1247_v61 = vunpack.c.l.b16 %v904_v54  ;;  %v1353_v38 = vunpack.c.l.b16 %v918_v39  ;;  %v909_v54 = vpack.c.bf16 %v3531_v45, %v3531_v45  ;;  %v908_v39 = vpack.c.bf16 %v3517_v13, %v3517_v13 }
 0x11f   :  { %v743_v51 = vpop.f32.mrf.mxu0  ;;  %v905_v45 = vpack.c.bf16 %v3478_v56, %v3478_v56 }
 0x120   :  { %v885_v24 = vpack.c.bf16 %v743_v51, %v743_v51  ;;  %v1137_v51 = vpack.c.b16 %v1126_v48, %v1125_v49  ;;  %v916_v48 = vpack.c.bf16 %v3504_v4, %v3504_v4 }
 0x122   :  { %2397 = vmatmul.msk.bf16.gmra.mxu0 %vm607_vm0, %v2734_v50  ;;  %v1129_v44 = vunpack.c.l.b16 %v885_v24  ;;  %v848_v59 = vpop.f32.mrf.mxu3 }
 0x127   :  { %v745_v5 = vpop.f32.mrf.mxu0 }
 0x128   :  { %v886_v17 = vpack.c.bf16 %v745_v5, %v745_v5 }
 0x12a   :  { %v1130_v28 = vunpack.c.l.b16 %v886_v17 }
 0x12c   :  { %v1139_v55 = vpack.c.b16 %v1130_v28, %v1129_v44  ;;  %v2421_v28 = vld [vmem:[%s3781_s5] sm:$0xf] }
 0x12f   :  { %v748_v9 = vpop.f32.mrf.mxu0 }
 0x130   :  { %v887_v15 = vpack.c.bf16 %v748_v9, %v748_v9  ;;  %v3545_v9 = vpop.f32.mrf.mxu1 }
 0x132   :  { %v1131_v25 = vunpack.c.l.b16 %v887_v15  ;;  %v2437_v15 = vld [vmem:[%s3781_s5 + $0x20] sm:$0xf] }
 0x137   :  { %v750_v16 = vpop.f32.mrf.mxu0 }
 0x138   :  { %v888_v18 = vpack.c.bf16 %v750_v16, %v750_v16  ;;  %v2758_v16 = vld [vmem:[%s3781_s5 + $0x2c] sm:$0xf0]  ;;  %v808_v31 = vpop.f32.mrf.mxu1 }
 0x139   :  { %v2438_v17 = vor.u32 %v2758_v16, %v2437_v15 }
 0x13a   :  { %v1132_v26 = vunpack.c.l.b16 %v888_v18 }
 0x13b   :  { %1047 = vmatpush.bf16.msra.mxu1 %v2438_v17  ;;  %v1351_v17 = vunpack.c.l.b16 %v916_v48 }
 0x13c   :  { %v1140_v29 = vpack.c.b16 %v1132_v26, %v1131_v25  ;;  %v830_v26 = vpop.f32.mrf.mxu2 }
 0x13e   :  { %1149 = vmatpush.bf16.msrb.mxu2 %v1140_v29  ;;  %v2754_v29 = vld [vmem:[%s3781_s5 + $0xc] sm:$0xf0] }
 0x13f   :  { %v753_v47 = vpop.f32.mrf.mxu0  ;;  %v2422_v33 = vor.u32 %v2754_v29, %v2421_v28 }
 0x140   :  { %v889_v50 = vpack.c.bf16 %v753_v47, %v753_v47  ;;  %v920_v47 = vpack.c.bf16 %v830_v26, %v830_v26  ;;  %v810_v29 = vpop.f32.mrf.mxu1 }
 0x141   :  { %1048 = vmatpush.bf16.msra.mxu1 %v2422_v33  ;;  %v850_v33 = vpop.f32.mrf.mxu3  ;;  %v912_v43 = vpack.c.bf16 %v810_v29, %v810_v29 }
 0x142   :  { %1150 = vmatpush.bf16.msrb.mxu2 %v1139_v55  ;;  %v3553_v18 = vunpack.c.l.b16 %v889_v50  ;;  %v2761_v55 = vld [vmem:[%s3781_s5 + $0x4c] sm:$0xf]  ;;  %v1355_v58 = vunpack.c.l.b16 %v920_v47  ;;  %v928_v35 = vpack.c.bf16 %v850_v33, %v850_v33 }
 0x144   :  { %2483 = vmatmul.msk.bf16.vlgmr.msra.gmra.mxu1 %vm607_vm0, %v3511_v7  ;;  %v1363_v49 = vpack.c.b16 %v1355_v58, %v1354_v57  ;;  %v1344_v57 = vunpack.c.l.b16 %v909_v54 }
 0x145   :  { %1087 = vmatpush.bf16.msrb.mxu1 %v2482_v41 }
 0x146   :  { %1151 = vmatpush.bf16.msrb.mxu2 %v1138_v63  ;;  %v1352_v63 = vunpack.c.l.b16 %v917_v36 }
 0x147   :  { %v755_v34 = vpop.f32.mrf.mxu0 }
 0x148   :  { %v890_v5 = vpack.c.bf16 %v755_v34, %v755_v34  ;;  %v1362_v26 = vpack.c.b16 %v1353_v38, %v1352_v63 }
 0x14a   :  { %v3555_v24 = vunpack.c.l.b16 %v890_v5  ;;  %1152 = vmatpush.bf16.msrb.mxu2 %v1137_v51  ;;  %v913_v51 = vpack.c.bf16 %v3444_v37, %v3444_v37  ;;  %v1255_v5 = vpack.c.b16 %v1247_v61, %v1246_v42  ;;  %v2434_v37 = vor.u32 %v2753_v10, %v2431_v11  ;;  %v2461_v10 = vld [vmem:[%s3781_s5 + $0x48] sm:$0xf] }
 0x14c   :  { %v1248_v25 = vpack.c.b16 %v3555_v24, %v3553_v18  ;;  %v1348_v40 = vunpack.c.l.b16 %v913_v51  ;;  %v2767_v51 = vld [vmem:[%s3781_s5 + $0x74] sm:$0xf0]  ;;  %v925_v18 = vpack.c.bf16 %v3543_v0, %v3543_v0  ;;  %v926_v24 = vpack.c.bf16 %v3559_v27, %v3559_v27 }
 0x14e   :  { %1153 = vmatpush.bf16.msrb.mxu2 %v1136_v32  ;;  %v2466_v32 = vor.u32 %v2761_v55, %v2463_v30  ;;  %v910_v55 = vpack.c.bf16 %v3545_v9, %v3545_v9 }
 0x14f   :  { %v758_v44 = vpop.f32.mrf.mxu0 }
 0x150   :  { %1088 = vmatpush.bf16.msrb.mxu1 %v2466_v32  ;;  %v891_v8 = vpack.c.bf16 %v758_v44, %v758_v44  ;;  %v3630_v44 = vunpack.c.l.b16 %v928_v35  ;;  %v907_v32 = vpack.c.bf16 %v3506_v6, %v3506_v6  ;;  %v1345_v58 = vunpack.c.l.b16 %v910_v55 }
 0x151   :  { %v906_v6 = vpack.c.bf16 %v3501_v52, %v3501_v52  ;;  %v3658_v52 = vpack.c.bf16 %v3519_v14, %v3414_v21  ;;  %v2763_v21 = vld [vmem:[%s3781_s5 + $0x54] sm:$0xf0] }
 0x152   :  { %1154 = vmatpush.bf16.msrb.mxu2 %v1135_v22  ;;  %v915_v22 = vpack.c.bf16 %v3486_v62, %v3486_v62  ;;  %v927_v62 = vpack.c.bf16 %v848_v59, %v848_v59  ;;  %v3618_v4 = vunpack.c.l.b16 %v891_v8  ;;  %v1342_v20 = vunpack.c.l.b16 %v907_v32 }
 0x153   :  { %v1358_v8 = vpack.c.b16 %v1345_v58, %v1344_v57  ;;  %v1341_v48 = vunpack.c.l.b16 %v906_v6  ;;  %v2462_v11 = vor.u32 %v2763_v21, %v2461_v10 }
 0x154   :  { %1089 = vmatpush.bf16.msrb.mxu1 %v2450_v23  ;;  %v1350_v16 = vunpack.c.l.b16 %v915_v22  ;;  %v1343_v22 = vunpack.c.l.b16 %v908_v39  ;;  %v1340_v23 = vunpack.c.l.b16 %v905_v45 }
 0x156   :  { %1155 = vmatpush.bf16.msrb.mxu2 %v1134_v12  ;;  %v914_v12 = vpack.c.bf16 %v3468_v46, %v3468_v46  ;;  %v3628_v46 = vunpack.c.l.b16 %v927_v62  ;;  %v1361_v2 = vpack.c.b16 %v1351_v17, %v1350_v16  ;;  %v1357_v63 = vpack.c.b16 %v1343_v22, %v1342_v20  ;;  %v2429_v17 = vld [vmem:[%s3781_s5 + $0x8] sm:$0xf] }
 0x157   :  { %v760_v50 = vpop.f32.mrf.mxu0  ;;  %v1356_v56 = vpack.c.b16 %v1341_v48, %v1340_v23 }
 0x158   :  { %v892_v34 = vpack.c.bf16 %v760_v50, %v760_v50  ;;  %1090 = vmatpush.bf16.msrb.mxu1 %v2434_v37  ;;  %v1349_v1 = vunpack.c.l.b16 %v914_v12  ;;  %v1473_v47 = vpack.c.b16 %v3630_v44, %v3628_v46  ;;  %v2445_v12 = vld [vmem:[%s3781_s5 + $0x28] sm:$0xf]  ;;  %v2759_v37 = vld [vmem:[%s3781_s5 + $0x34] sm:$0xf0] }
 0x159   :  { %v2446_v16 = vor.u32 %v2759_v37, %v2445_v12  ;;  %v1213_v37 = vunpack.c.h.b16 %v3363_v60 }
 0x15a   :  { %v3620_v15 = vunpack.c.l.b16 %v892_v34  ;;  %1156 = vmatpush.bf16.msrb.mxu2 %v1133_v3  ;;  %v911_v3 = vpack.c.bf16 %v808_v31, %v808_v31  ;;  %v1360_v53 = vpack.c.b16 %v1349_v1, %v1348_v40  ;;  %v1347_v31 = vunpack.c.l.b16 %v912_v43  ;;  %v2477_v34 = vld [vmem:[%s3781_s5 + $0x68] sm:$0xf]  ;;  %v3689_v43 = vpop.f32.mrf.mxu2 }
 0x15b   :  { %2486 = vmatmul.msk.bf16.vlgmr.msrb.gmra.mxu1 %vm607_vm0, %v3511_v7 }
 0x15c   :  { %v1249_v28 = vpack.c.b16 %v3620_v15, %v3618_v4  ;;  %1264 = vmatpush.bf16.msra.mxu1 %v1255_v5  ;;  %v1346_v30 = vunpack.c.l.b16 %v911_v3  ;;  %v2478_v5 = vor.u32 %v2767_v51, %v2477_v34 }
 0x15d   :  { %1157 = vmatmul.bf16.vlgmr.msrb.gmra.mxu2 %v3363_v60 }
 0x15e   :  { %1372 = vmatpush.bf16.msra.mxu2 %v1363_v49  ;;  %v1359_v59 = vpack.c.b16 %v1347_v31, %v1346_v30  ;;  %v3654_v49 = vpop.f32.mrf.mxu3  ;;  %1073 = vmatpush.bf16.msra.mxu3 %v2478_v5 }
 0x15f   :  { %v763_v41 = vpop.f32.mrf.mxu0 }
 0x160   :  { %v893_v36 = vpack.c.bf16 %v763_v41, %v763_v41 }
 0x162   :  { %1373 = vmatpush.bf16.msra.mxu2 %v1362_v26  ;;  %v3646_v9 = vunpack.c.l.b16 %v893_v36  ;;  %1074 = vmatpush.bf16.msra.mxu3 %v2462_v11  ;;  %v2755_v26 = vld [vmem:[%s3781_s5 + $0x14] sm:$0xf0] }
 0x163   :  { %v2430_v33 = vor.u32 %v2755_v26, %v2429_v17 }
 0x166   :  { %1374 = vmatpush.bf16.msra.mxu2 %v1361_v2  ;;  %v3667_v62 = vpop.f32.mrf.mxu3  ;;  %1075 = vmatpush.bf16.msra.mxu3 %v2446_v16 }
 0x167   :  { %v765_v42 = vpop.f32.mrf.mxu0  ;;  %v930_v4 = vpack.c.bf16 %v3667_v62, %v3667_v62  ;;  %v1459_v62 = vunpack.c.l.b16 %v926_v24 }
 0x168   :  { %v894_v61 = vpack.c.bf16 %v765_v42, %v765_v42 }
 0x16a   :  { %1375 = vmatpush.bf16.msra.mxu2 %v1360_v53  ;;  %v3648_v19 = vunpack.c.l.b16 %v894_v61  ;;  %1076 = vmatpush.bf16.msra.mxu3 %v2430_v33  ;;  %v3691_v61 = vpop.f32.mrf.mxu2 }
 0x16b   :  { %v922_v0 = vpack.c.bf16 %v3691_v61, %v3691_v61 }
 0x16c   :  { %v1250_v13 = vpack.c.b16 %v3648_v19, %v3646_v9  ;;  %v1214_v9 = vpack.c.b16 %v1213_v37, %v1213_v37  ;;  %v929_v19 = vpack.c.bf16 %v3654_v49, %v3654_v49  ;;  %v1458_v49 = vunpack.c.l.b16 %v925_v18 }
 0x16d   :  { %2485 = vmatmul.msk.bf16.vlgmr.msra.gmra.mxu3 %vm607_vm0, %v3511_v7 }
 0x16e   :  { %1376 = vmatpush.bf16.msra.mxu2 %v1359_v59  ;;  %v858_v35 = vpop.f32.mrf.mxu3 }
 0x16f   :  { %v768_v38 = vpop.f32.mrf.mxu0  ;;  %v931_v16 = vpack.c.bf16 %v858_v35, %v858_v35  ;;  %v1462_v35 = vunpack.c.l.b16 %v929_v19 }
 0x171   :  { %v1464_v15 = vunpack.c.l.b16 %v931_v16 }
 0x172   :  { %1377 = vmatpush.bf16.msra.mxu2 %v1358_v8  ;;  %v895_v8 = vpack.c.bf16 %v768_v38, %v768_v38  ;;  %v838_v51 = vpop.f32.mrf.mxu2 }
 0x176   :  { %1378 = vmatpush.bf16.msra.mxu2 %v1357_v63  ;;  %v860_v1 = vpop.f32.mrf.mxu3 }
 0x177   :  { %v770_v50 = vpop.f32.mrf.mxu0  ;;  %v932_v17 = vpack.c.bf16 %v860_v1, %v860_v1 }
 0x178   :  { %v896_v45 = vpack.c.bf16 %v770_v50, %v770_v50 }
 0x17a   :  { %1379 = vmatpush.bf16.msra.mxu2 %v1356_v56  ;;  %v1239_v48 = vunpack.c.l.b16 %v896_v45  ;;  %v1238_v56 = vunpack.c.l.b16 %v895_v8  ;;  %v840_v12 = vpop.f32.mrf.mxu2 }
 0x17c   :  { %v1251_v34 = vpack.c.b16 %v1239_v48, %v1238_v56 }
 0x17d   :  { %1380 = vmatmul.bf16.vlgmr.msra.gmra.mxu2 %v3658_v52 }
 0x17e   :  { %v863_v3 = vpop.f32.mrf.mxu3 }
 0x17f   :  { %v773_v14 = vpop.f32.mrf.mxu0  ;;  %v933_v50 = vpack.c.bf16 %v863_v3, %v863_v3  ;;  %v924_v3 = vpack.c.bf16 %v840_v12, %v840_v12 }
 0x180   :  { %v897_v42 = vpack.c.bf16 %v773_v14, %v773_v14 }
 0x181   :  { %v1466_v26 = vunpack.c.l.b16 %v933_v50  ;;  %v1457_v27 = vunpack.c.l.b16 %v924_v3 }
 0x182   :  { %v1240_v23 = vunpack.c.l.b16 %v897_v42 }
 0x186   :  { %v865_v54 = vpop.f32.mrf.mxu3 }
 0x187   :  { %v775_v29 = vpop.f32.mrf.mxu0  ;;  %v934_v14 = vpack.c.bf16 %v865_v54, %v865_v54  ;;  %v921_v54 = vpack.c.bf16 %v3689_v43, %v3689_v43 }
 0x188   :  { %v898_v57 = vpack.c.bf16 %v775_v29, %v775_v29 }
 0x189   :  { %v1467_v29 = vunpack.c.l.b16 %v934_v14 }
 0x18a   :  { %v1241_v6 = vunpack.c.l.b16 %v898_v57 }
 0x18b   :  { %v1476_v60 = vpack.c.b16 %v1467_v29, %v1466_v26 }
 0x18c   :  { %v1252_v63 = vpack.c.b16 %v1241_v6, %v1240_v23 }
 0x18e   :  { %v868_v22 = vpop.f32.mrf.mxu3 }
 0x18f   :  { %v778_v40 = vpop.f32.mrf.mxu0  ;;  %v935_v10 = vpack.c.bf16 %v868_v22, %v868_v22 }
 0x190   :  { %v899_v32 = vpack.c.bf16 %v778_v40, %v778_v40  ;;  %v1463_v40 = vunpack.c.l.b16 %v930_v4 }
 0x191   :  { %v1468_v11 = vunpack.c.l.b16 %v935_v10 }
 0x192   :  { %v1242_v7 = vunpack.c.l.b16 %v899_v32 }
 0x196   :  { %v870_v5 = vpop.f32.mrf.mxu3 }
 0x197   :  { %v780_v2 = vpop.f32.mrf.mxu0  ;;  %v936_v21 = vpack.c.bf16 %v870_v5, %v870_v5 }
 0x198   :  { %v900_v30 = vpack.c.bf16 %v780_v2, %v780_v2  ;;  %v923_v2 = vpack.c.bf16 %v838_v51, %v838_v51 }
 0x199   :  { %v1469_v38 = vunpack.c.l.b16 %v936_v21 }
 0x19a   :  { %v1243_v58 = vunpack.c.l.b16 %v900_v30  ;;  %v1454_v30 = vunpack.c.l.b16 %v921_v54 }
 0x19b   :  { %v1477_v33 = vpack.c.b16 %v1469_v38, %v1468_v11 }
 0x19c   :  { %v1253_v20 = vpack.c.b16 %v1243_v58, %v1242_v7 }
 0x19f   :  { %v783_v41 = vpop.f32.mrf.mxu0 }
 0x1a0   :  { %v901_v53 = vpack.c.bf16 %v783_v41, %v783_v41 }
 0x1a2   :  { %v1244_v36 = vunpack.c.l.b16 %v901_v53  ;;  %v1472_v53 = vpack.c.b16 %v1459_v62, %v1458_v49 }
 0x1a7   :  { %v785_v55 = vpop.f32.mrf.mxu0 }
 0x1a8   :  { %v902_v31 = vpack.c.bf16 %v785_v55, %v785_v55  ;;  %v1456_v55 = vunpack.c.l.b16 %v923_v2 }
 0x1aa   :  { %v1245_v39 = vunpack.c.l.b16 %v902_v31  ;;  %v1455_v31 = vunpack.c.l.b16 %v922_v0  ;;  %v1471_v32 = vpack.c.b16 %v1457_v27, %v1456_v55 }
 0x1ac   :  { %v1254_v59 = vpack.c.b16 %v1245_v39, %v1244_v36  ;;  %v1435_v36 = vunpack.c.h.b16 %v3658_v52  ;;  %v1470_v46 = vpack.c.b16 %v1455_v31, %v1454_v30 }
 0x1ae   :  { %1265 = vmatpush.bf16.msra.mxu1 %v1254_v59  ;;  %v1436_v43 = vpack.c.b16 %v1435_v36, %v1435_v36 }
 0x1b2   :  { %1266 = vmatpush.bf16.msra.mxu1 %v1253_v20 }
 0x1b6   :  { %1267 = vmatpush.bf16.msra.mxu1 %v1252_v63 }
 0x1ba   :  { %1268 = vmatpush.bf16.msra.mxu1 %v1251_v34 }
 0x1be   :  { %1269 = vmatpush.bf16.msra.mxu1 %v1250_v13  ;;  %v1064_v13 = vpop.f32.mrf.mxu2 }
 0x1c1   :  { %v1050_v57 = vpop.f32.mrf.mxu1 }
 0x1c2   :  { %1270 = vmatpush.bf16.msra.mxu1 %v1249_v28  ;;  %v1465_v28 = vunpack.c.l.b16 %v932_v17  ;;  %v1097_v59 = vpack.c.bf16 %v1064_v13, %v1050_v57 }
 0x1c4   :  { %v1475_v1 = vpack.c.b16 %v1465_v28, %v1464_v15  ;;  %v1191_v7 = vunpack.c.l.b16 %v1097_v59  ;;  %v1303_v61 = vunpack.c.h.b16 %v1097_v59 }
 0x1c6   :  { %1271 = vmatpush.bf16.msra.mxu1 %v1248_v25  ;;  %v1474_v25 = vpack.c.b16 %v1463_v40, %v1462_v35  ;;  %v1066_v41 = vpop.f32.mrf.mxu2 }
 0x1c9   :  { %1272 = vmatmul.bf16.vlgmr.msra.gmra.mxu1 %v1214_v9  ;;  %v1052_v42 = vpop.f32.mrf.mxu1 }
 0x1ca   :  { %1486 = vmatpush.bf16.msrb.mxu1 %v1477_v33  ;;  %v1099_v45 = vpack.c.bf16 %v1066_v41, %v1052_v42 }
 0x1cc   :  { %v1192_v6 = vunpack.c.l.b16 %v1099_v45  ;;  %v1304_v20 = vunpack.c.h.b16 %v1099_v45 }
 0x1ce   :  { %1487 = vmatpush.bf16.msrb.mxu1 %v1476_v60  ;;  %v1193_v52 = vpack.c.b16 %v1192_v6, %v1191_v7  ;;  %v1305_v22 = vpack.c.b16 %v1304_v20, %v1303_v61  ;;  %v2775_v7 = vld [vmem:[#allocation2 + $0x38] sm:$0xff]  ;;  %v2774_v61 = vld [vmem:[#allocation2 + $0x30] sm:$0xff]  ;;  %v2773_v6 = vld [vmem:[#allocation2 + $0x28] sm:$0xff] }
 0x1cf   :  { %1806 = vmatpush.bf16.msrb.mxu2 %v2775_v7  ;;  %v2786_v7 = vld [vmem:[#allocation2 + $0x90] sm:$0xff] }
 0x1d0   :  { %1205 = vmatpush.bf16.msrb.mxu3 %v1193_v52  ;;  %v2772_v52 = vld [vmem:[#allocation2 + $0x20] sm:$0xff] }
 0x1d2   :  { %1488 = vmatpush.bf16.msrb.mxu1 %v1475_v1 }
 0x1d3   :  { %1807 = vmatpush.bf16.msrb.mxu2 %v2774_v61  ;;  %v2798_v61 = vld [vmem:[#allocation2 + $0xf0] sm:$0xff] }
 0x1d4   :  { %1317 = vmatpush.bf16.msra.mxu3 %v1305_v22 }
 0x1d6   :  { %1489 = vmatpush.bf16.msrb.mxu1 %v1474_v25 }
 0x1d7   :  { %1808 = vmatpush.bf16.msrb.mxu2 %v2773_v6  ;;  %v2797_v6 = vld [vmem:[#allocation2 + $0xe8] sm:$0xff] }
 0x1d8   :  { %v1092_v56 = vpop.f32.mrf.mxu1 }
 0x1da   :  { %1490 = vmatpush.bf16.msrb.mxu1 %v1473_v47 }
 0x1db   :  { %1809 = vmatpush.bf16.msrb.mxu2 %v2772_v52  ;;  %v2796_v52 = vld [vmem:[#allocation2 + $0xe0] sm:$0xff] }
 0x1de   :  { %1491 = vmatpush.bf16.msrb.mxu1 %v1472_v53 }
 0x1e0   :  { %v1158_v39 = vpop.f32.mrf.mxu2  ;;  %v1094_v5 = vpop.f32.mrf.mxu1 }
 0x1e1   :  { %v1162_v44 = vmul.f32 0.088388346, %v1158_v39 }
 0x1e2   :  { %1492 = vmatpush.bf16.msrb.mxu1 %v1471_v32 }
 0x1e3   :  { %v1164_v47 = vsel %vm1163_vm1, %v1162_v44, -inf }
 0x1e4   :  { %1165 = vmax.xlane.f32.xlu0 %v1164_v47 }
 0x1e6   :  { %1493 = vmatpush.bf16.msrb.mxu1 %v1470_v46 }
 0x1e8   :  { %v1160_v58 = vpop.f32.mrf.mxu2 }
 0x1e9   :  { %1494 = vmatmul.bf16.vlgmr.msrb.gmra.mxu1 %v1436_v43 }
 0x1f0   :  { %v1078_v34 = vpop.f32.mrf.mxu3 }
 0x1f1   :  { %v1098_v51 = vpack.c.bf16 %v1092_v56, %v1078_v34  ;;  %v2770_v34 = vld [vmem:[#allocation2 + $0x10] sm:$0xff] }
 0x1f3   :  { %v1413_v21 = vunpack.c.l.b16 %v1098_v51  ;;  %v1525_v50 = vunpack.c.h.b16 %v1098_v51 }
 0x1f8   :  { %v1080_v10 = vpop.f32.mrf.mxu3 }
 0x1f9   :  { %v1100_v14 = vpack.c.bf16 %v1094_v5, %v1080_v10 }
 0x1fb   :  { %v1414_v11 = vunpack.c.l.b16 %v1100_v14  ;;  %v1526_v38 = vunpack.c.h.b16 %v1100_v14  ;;  %v2769_v14 = vld [vmem:[#allocation2 + $0x8] sm:$0xff] }
 0x1fd   :  { %v1415_v12 = vpack.c.b16 %v1414_v11, %v1413_v21  ;;  %v3721_v37 = vpack.c.b16 %v1526_v38, %v1525_v50 }
 0x200   :  { %v1381_v8 = vpop.f32.mrf.mxu2 }
 0x201   :  { %v1385_v23 = vmul.f32 0.088388346, %v1381_v8  ;;  %v2771_v8 = vld [vmem:[#allocation2 + $0x18] sm:$0xff] }
 0x202   :  { %1810 = vmatpush.bf16.msrb.mxu2 %v2771_v8  ;;  %v2794_v8 = vld [vmem:[#allocation2 + $0xd0] sm:$0xff] }
 0x203   :  { %v1386_v48 = vsel %vm1163_vm1, %v1385_v23, -inf }
 0x204   :  { %1387 = vmax.xlane.f32.xlu1 %v1386_v48 }
 0x206   :  { %1811 = vmatpush.bf16.msrb.mxu2 %v2770_v34 }
 0x208   :  { %v1383_v63 = vpop.f32.mrf.mxu2 }
 0x20a   :  { %1812 = vmatpush.bf16.msrb.mxu2 %v2769_v14 }
 0x246   :  { %v1273_v16 = vpop.f32.mrf.mxu1 }
 0x247   :  { %v1277_v17 = vmul.f32 0.088388346, %v1273_v16 }
 0x249   :  { %v1278_v26 = vsel %vm1163_vm1, %v1277_v17, -inf }
 0x24a   :  { %1279 = vmax.xlane.f32.xlu0 %v1278_v26  ;;  %v2768_v26 = vld [vmem:[#allocation2] sm:$0xff] }
 0x24b   :  { %1813 = vmatpush.bf16.msrb.mxu2 %v2768_v26 }
 0x24e   :  { %v1275_v29 = vpop.f32.mrf.mxu1 }
 0x257   :  { %v1166_v33 = vpop.xlane.xlu0 %1165 }
 0x258   :  { %v1167_v9 = vsub.f32 %v1162_v44, %v1166_v33 }
 0x25a   :  { %v1168_v19 = vmul.f32 1.442695, %v1167_v9 }
 0x25c   :  { %2842 = vpow2.f32 %v1168_v19 }
 0x262   :  { %v2843_v4 = vpop.eup %2842 }
 0x263   :  { %v1170_v28 = vsel %vm1163_vm1, %v2843_v4, 0.0 }
 0x264   :  { %1171 = vadd.xlane.f32.xlu2 %v1170_v28  ;;  %v2791_v28 = vld [vmem:[#allocation2 + $0xb8] sm:$0xff] }
 0x265   :  { %1832 = vmatpush.bf16.msra.mxu1 %v2791_v28 }
 0x266   :  { %v1495_v15 = vpop.f32.mrf.mxu1 }
 0x267   :  { %v1499_v60 = vmul.f32 0.088388346, %v1495_v15 }
 0x269   :  { %v1500_v13 = vsel %vm1163_vm1, %v1499_v60, -inf }
 0x26a   :  { %1501 = vmax.xlane.f32.xlu1 %v1500_v13 }
 0x26e   :  { %v1497_v35 = vpop.f32.mrf.mxu1 }
 0x26f   :  { %v2790_v35 = vld [vmem:[#allocation2 + $0xb0] sm:$0xff] }
 0x270   :  { %1833 = vmatpush.bf16.msra.mxu1 %v2790_v35 }
 0x277   :  { %v1388_v40 = vpop.xlane.xlu1 %1387 }
 0x278   :  { %v1389_v1 = vsub.f32 %v1385_v23, %v1388_v40 }
 0x27a   :  { %v1390_v18 = vmul.f32 1.442695, %v1389_v1  ;;  %v2789_v1 = vld [vmem:[#allocation2 + $0xa8] sm:$0xff] }
 0x27b   :  { %1834 = vmatpush.bf16.msra.mxu1 %v2789_v1 }
 0x27c   :  { %2844 = vpow2.f32 %v1390_v18  ;;  %v2783_v18 = vld [vmem:[#allocation2 + $0x78] sm:$0xff] }
 0x282   :  { %v3726_v24 = vpop.eup %2844 }
 0x283   :  { %v1392_v25 = vsel %vm1163_vm1, %v3726_v24, 0.0 }
 0x284   :  { %1393 = vadd.xlane.f32.xlu0 %v1392_v25 }
 0x2bd   :  { %v1280_v49 = vpop.xlane.xlu0 %1279 }
 0x2be   :  { %v1281_v62 = vsub.f32 %v1277_v17, %v1280_v49 }
 0x2c0   :  { %v1282_v2 = vmul.f32 1.442695, %v1281_v62 }
 0x2c2   :  { %2846 = vpow2.f32 %v1282_v2  ;;  %v2782_v2 = vld [vmem:[#allocation2 + $0x70] sm:$0xff] }
 0x2c8   :  { %v3730_v3 = vpop.eup %2846 }
 0x2c9   :  { %v1284_v41 = vsel %vm1163_vm1, %v3730_v3, 0.0 }
 0x2ca   :  { %1285 = vadd.xlane.f32.xlu2 %v1284_v41 }
 0x2d7   :  { %v1172_v53 = vpop.xlane.xlu2 %1171 }
 0x2d8   :  { %2848 = vrcp.f32 %v1172_v53  ;;  %v1184_v32 = vand.u32 2147483648, %v1172_v53  ;;  %v1182_v39 = vand.u32 2147483647, %v1172_v53  ;;  %vm1178_vm3 = vweird.f32 %v1172_v53 }
 0x2da   :  { %v1185_v47 = vor.u32 1.1754944e-38, %v1184_v32  ;;  %vm1183_vm5 = vcmp.eq.f32.partialorder %v1182_v39, 8.507059e+37 }
 0x2dd   :  { %v1502_v54 = vpop.xlane.xlu1 %1501 }
 0x2de   :  { %v1503_v0 = vsub.f32 %v1499_v60, %v1502_v54  ;;  %v2849_v27 = vpop.eup %2848 }
 0x2df   :  { %v1174_v30 = vmul.f32 %v2849_v27, %v1172_v53  ;;  %vm1179_vm2 = vweird.f32 %v2849_v27 }
 0x2e0   :  { %v1504_v55 = vmul.f32 1.442695, %v1503_v0  ;;  %vm1180_vm4 = vmor %vm1178_vm3, %vm1179_vm2 }
 0x2e1   :  { %v1175_v31 = vsub.f32 1.0, %v1174_v30  ;;  %v2780_v30 = vld [vmem:[#allocation2 + $0x60] sm:$0xff] }
 0x2e2   :  { %2850 = vpow2.f32 %v1504_v55 }
 0x2e3   :  { %v1176_v36 = vmul.f32 %v2849_v27, %v1175_v31 }
 0x2e5   :  { %v1177_v44 = vadd.f32 %v2849_v27, %v1176_v36  ;;  %v2779_v36 = vld [vmem:[#allocation2 + $0x58] sm:$0xff] }
 0x2e7   :  { %v1181_v57 = vsel %vm1180_vm4, %v2849_v27, %v1177_v44 }
 0x2e8   :  { %v3734_v46 = vpop.eup %2850  ;;  %v1186_v58 = vsel %vm1183_vm5, %v1185_v47, %v1181_v57  ;;  %v2778_v47 = vld [vmem:[#allocation2 + $0x50] sm:$0xff]  ;;  %v2777_v57 = vld [vmem:[#allocation2 + $0x48] sm:$0xff] }
 0x2e9   :  { %v1506_v43 = vsel %vm1163_vm1, %v3734_v46, 0.0  ;;  %v1187_v59 = vmul.f32 %v2843_v4, %v1186_v58  ;;  %v2776_v58 = vld [vmem:[#allocation2 + $0x40] sm:$0xff] }
 0x2ea   :  { %1507 = vadd.xlane.f32.xlu1 %v1506_v43 }
 0x2eb   :  { %v1188_v42 = vpack.c.bf16 %v1187_v59, %v1187_v59  ;;  %v2788_v59 = vld [vmem:[#allocation2 + $0xa0] sm:$0xff] }
 0x2ec   :  { %1835 = vmatpush.bf16.msra.mxu1 %v2788_v59 }
 0x2ed   :  { %2487 = vmatmul.msk.bf16.vlgmr.msrb.gmra.mxu3 %vm1163_vm1, %v1188_v42  ;;  %v2787_v42 = vld [vmem:[#allocation2 + $0x98] sm:$0xff] }
 0x2ee   :  { %1427 = vmatpush.bf16.msrb.mxu3 %v1415_v12 }
 0x2f0   :  { %1836 = vmatpush.bf16.msra.mxu1 %v2787_v42 }
 0x2f4   :  { %1837 = vmatpush.bf16.msra.mxu1 %v2786_v7 }
 0x2f7   :  { %v1394_v45 = vpop.xlane.xlu0 %1393 }
 0x2f8   :  { %2852 = vrcp.f32 %v1394_v45  ;;  %v1406_v9 = vand.u32 2147483648, %v1394_v45  ;;  %vm1400_vm11 = vweird.f32 %v1394_v45  ;;  %v1404_v19 = vand.u32 2147483647, %v1394_v45 }
 0x2fa   :  { %v1407_v15 = vor.u32 1.1754944e-38, %v1406_v9  ;;  %vm1405_vm13 = vcmp.eq.f32.partialorder %v1404_v19, 8.507059e+37 }
 0x2fe   :  { %v2853_v22 = vpop.eup %2852 }
 0x2ff   :  { %v1396_v63 = vmul.f32 %v2853_v22, %v1394_v45  ;;  %vm1401_vm10 = vweird.f32 %v2853_v22  ;;  %v2785_v45 = vld [vmem:[#allocation2 + $0x88] sm:$0xff] }
 0x300   :  { %vm1402_vm12 = vmor %vm1400_vm11, %vm1401_vm10  ;;  %1838 = vmatpush.bf16.msra.mxu1 %v2785_v45  ;;  %v2836_v45 = vld [vmem:[%s3784_s8] ss:$0 sm:$0xff] }
 0x301   :  { %v1397_v21 = vsub.f32 1.0, %v1396_v63 }
 0x303   :  { %v1398_v16 = vmul.f32 %v2853_v22, %v1397_v21 }
 0x305   :  { %v1399_v33 = vadd.f32 %v2853_v22, %v1398_v16 }
 0x307   :  { %v1403_v4 = vsel %vm1402_vm12, %v2853_v22, %v1399_v33  ;;  %v2795_v22 = vld [vmem:[#allocation2 + $0xd8] sm:$0xff] }
 0x308   :  { %v1408_v60 = vsel %vm1405_vm13, %v1407_v15, %v1403_v4 }
 0x309   :  { %v1409_v40 = vmul.f32 %v3726_v24, %v1408_v60  ;;  %v2781_v24 = vld [vmem:[#allocation2 + $0x68] sm:$0xff]  ;;  %v2971_v60 = vmov 128.0  }
 0x30b   :  { %v1410_v49 = vpack.c.bf16 %v1409_v40, %v1409_v40 }
 0x33d   :  { %v1286_v20 = vpop.xlane.xlu2 %1285 }
 0x33e   :  { %2854 = vrcp.f32 %v1286_v20  ;;  %v1298_v51 = vand.u32 2147483648, %v1286_v20  ;;  %v1296_v10 = vand.u32 2147483647, %v1286_v20  ;;  %vm1292_vm7 = vweird.f32 %v1286_v20 }
 0x340   :  { %v1299_v11 = vor.u32 1.1754944e-38, %v1298_v51  ;;  %vm1297_vm9 = vcmp.eq.f32.partialorder %v1296_v10, 8.507059e+37 }
 0x344   :  { %v2855_v23 = vpop.eup %2854 }
 0x345   :  { %v1288_v48 = vmul.f32 %v2855_v23, %v1286_v20  ;;  %vm1293_vm6 = vweird.f32 %v2855_v23  ;;  %v2784_v20 = vld [vmem:[#allocation2 + $0x80] sm:$0xff] }
 0x346   :  { %vm1294_vm8 = vmor %vm1292_vm7, %vm1293_vm6  ;;  %1839 = vmatpush.bf16.msra.mxu1 %v2784_v20  ;;  %v2837_v20 = vld [vmem:[%s3785_s9] ss:$0 sm:$0xff] }
 0x347   :  { %v1289_v56 = vsub.f32 1.0, %v1288_v48  ;;  %v2792_v48 = vld [vmem:[#allocation2 + $0xc0] sm:$0xff] }
 0x349   :  { %v1290_v5 = vmul.f32 %v2855_v23, %v1289_v56 }
 0x34b   :  { %v1291_v50 = vadd.f32 %v2855_v23, %v1290_v5 }
 0x34d   :  { %v1295_v38 = vsel %vm1294_vm8, %v2855_v23, %v1291_v50  ;;  %v2793_v23 = vld [vmem:[#allocation2 + $0xc8] sm:$0xff] }
 0x34e   :  { %v1300_v12 = vsel %vm1297_vm9, %v1299_v11, %v1295_v38 }
 0x34f   :  { %v1301_v17 = vmul.f32 %v3730_v3, %v1300_v12 }
 0x351   :  { %v1302_v29 = vpack.c.bf16 %v1301_v17, %v1301_v17 }
 0x353   :  { %2488 = vmatmul.msk.bf16.vlgmr.msra.gmra.mxu3 %vm1163_vm1, %v1302_v29  ;;  %v2835_v29 = vld [vmem:[%s3783_s7] ss:$0 sm:$0xff] }
 0x354   :  { %1539 = vmatpush.bf16.msra.mxu3 %v3721_v37 }
 0x35d   :  { %v1508_v13 = vpop.xlane.xlu1 %1507 }
 0x35e   :  { %2856 = vrcp.f32 %v1508_v13  ;;  %v1520_v3 = vand.u32 2147483648, %v1508_v13  ;;  %v1518_v53 = vand.u32 2147483647, %v1508_v13  ;;  %vm1514_vm15 = vweird.f32 %v1508_v13 }
 0x35f   :  { %2858 = vrcp.f32 %v2971_v60 }
 0x360   :  { %v1521_v0 = vor.u32 1.1754944e-38, %v1520_v3  ;;  %vm1519_vm2 = vcmp.eq.f32.partialorder %v1518_v53, 8.507059e+37  ;;  %v2805_v53 = vld [vmem:[#allocation5 + $0x28] sm:$0xff] }
 0x363   :  { %2489 = vmatmul.msk.bf16.vlgmr.msrb.gmra.mxu3 %vm1163_vm1, %v1410_v49 }
 0x364   :  { %v2857_v25 = vpop.eup %2856  ;;  %1819 = vmatpush.bf16.msrb.mxu3 %v2783_v18 }
 0x365   :  { %v1510_v37 = vmul.f32 %v2857_v25, %v1508_v13  ;;  %vm1515_vm14 = vweird.f32 %v2857_v25  ;;  %v2807_v13 = vld [vmem:[#allocation5 + $0x38] sm:$0xff]  ;;  %v2859_v35 = vpop.eup %2858 }
 0x366   :  { %vm1516_vm0 = vmor %vm1514_vm15, %vm1515_vm14  ;;  %v1863_v40 = vmul.f32 128.0, %v2859_v35 }
 0x367   :  { %v1511_v62 = vsub.f32 1.0, %v1510_v37 }
 0x368   :  { %1820 = vmatpush.bf16.msrb.mxu3 %v2782_v2  ;;  %v1864_v1 = vsub.f32 1.0, %v1863_v40  ;;  %v2840_v40 = vld [vmem:[%s3790_s14] ss:$0 sm:$0xff] }
 0x369   :  { %v1512_v41 = vmul.f32 %v2857_v25, %v1511_v62 }
 0x36a   :  { %v1865_v18 = vmul.f32 %v2859_v35, %v1864_v1 }
 0x36b   :  { %v1513_v54 = vadd.f32 %v2857_v25, %v1512_v41  ;;  %v2806_v41 = vld [vmem:[#allocation5 + $0x30] sm:$0xff] }
 0x36c   :  { %1821 = vmatpush.bf16.msrb.mxu3 %v2781_v24  ;;  %v2803_v24 = vld [vmem:[#allocation5 + $0x18] sm:$0xff] }
 0x36d   :  { %v1517_v55 = vsel %vm1516_vm0, %v2857_v25, %v1513_v54  ;;  %v1866_v25 = vadd.f32 %v2859_v35, %v1865_v18  ;;  %v2804_v54 = vld [vmem:[#allocation5 + $0x20] sm:$0xff] }
 0x36e   :  { %v1522_v27 = vsel %vm1519_vm2, %v1521_v0, %v1517_v55  ;;  %v2802_v0 = vld [vmem:[#allocation5 + $0x10] sm:$0xff]  ;;  %v2801_v55 = vld [vmem:[#allocation5 + $0x8] sm:$0xff] }
 0x36f   :  { %v1523_v31 = vmul.f32 %v3734_v46, %v1522_v27  ;;  %v2799_v46 = vld [vmem:[#allocation2 + $0xf8] sm:$0xff]  ;;  %v2800_v27 = vld [vmem:[#allocation5] sm:$0xff] }
 0x370   :  { %v1207_v32 = vpop.f32.mrf.mxu3  ;;  %1822 = vmatpush.bf16.msrb.mxu3 %v2780_v30  ;;  %1845 = vmatpush.bf16.msra.mxu2 %v2799_v46  ;;  %v2815_v30 = vld [vmem:[#allocation7 + $0x38] sm:$0xff]  ;;  %v2810_v46 = vld [vmem:[#allocation7 + $0x10] sm:$0xff] }
 0x371   :  { %v1211_v39 = vpack.c.bf16 %v1207_v32, %v1207_v32  ;;  %v1524_v44 = vpack.c.bf16 %v1523_v31, %v1523_v31  ;;  %2047 = vmatpush.bf16.msrb.mxu1 %v2815_v30 }
 0x373   :  { %2490 = vmatmul.msk.bf16.vlgmr.msra.gmra.mxu3 %vm1163_vm1, %v1524_v44  ;;  %1814 = vmatmul.bf16.vlgmr.msrb.gmra.mxu2 %v1211_v39  ;;  %vm1867_vm1 = vweird.f32 %v2859_v35  ;;  %v2813_v44 = vld [vmem:[#allocation7 + $0x28] sm:$0xff] }
 0x374   :  { %1823 = vmatpush.bf16.msrb.mxu3 %v2779_v36  ;;  %1846 = vmatpush.bf16.msra.mxu2 %v2798_v61  ;;  %v3749_v49 = vsel %vm1867_vm1, %v2859_v35, %v1866_v25  ;;  %v2814_v36 = vld [vmem:[#allocation7 + $0x30] sm:$0xff]  ;;  %v2841_v25 = vld [vmem:[%s3791_s15] ss:$0 sm:$0xff] }
 0x375   :  { %2048 = vmatpush.bf16.msrb.mxu1 %v2814_v36 }
 0x378   :  { %v1209_v43 = vpop.f32.mrf.mxu3  ;;  %1824 = vmatpush.bf16.msrb.mxu3 %v2778_v47  ;;  %1847 = vmatpush.bf16.msra.mxu2 %v2797_v6  ;;  %v2812_v47 = vld [vmem:[#allocation7 + $0x20] sm:$0xff] }
 0x379   :  { %2049 = vmatpush.bf16.msrb.mxu1 %v2813_v44 }
 0x37c   :  { %1825 = vmatpush.bf16.msrb.mxu3 %v2777_v57  ;;  %1848 = vmatpush.bf16.msra.mxu2 %v2796_v52 }
 0x37d   :  { %2050 = vmatpush.bf16.msrb.mxu1 %v2812_v47 }
 0x380   :  { %1826 = vmatpush.bf16.msrb.mxu3 %v2776_v58  ;;  %1849 = vmatpush.bf16.msra.mxu2 %v2795_v22  ;;  %v2811_v58 = vld [vmem:[#allocation7 + $0x18] sm:$0xff] }
 0x381   :  { %2051 = vmatpush.bf16.msrb.mxu1 %v2811_v58 }
 0x384   :  { %1850 = vmatpush.bf16.msra.mxu2 %v2794_v8  ;;  %1964 = vmatpush.bf16.msra.mxu3 %v2807_v13 }
 0x385   :  { %2052 = vmatpush.bf16.msrb.mxu1 %v2810_v46 }
 0x388   :  { %1851 = vmatpush.bf16.msra.mxu2 %v2793_v23  ;;  %1965 = vmatpush.bf16.msra.mxu3 %v2806_v41 }
 0x38c   :  { %1852 = vmatpush.bf16.msra.mxu2 %v2792_v48  ;;  %1966 = vmatpush.bf16.msra.mxu3 %v2805_v53  ;;  %v2809_v48 = vld [vmem:[#allocation7 + $0x8] sm:$0xff] }
 0x38d   :  { %2053 = vmatpush.bf16.msrb.mxu1 %v2809_v48 }
 0x390   :  { %1967 = vmatpush.bf16.msra.mxu3 %v2804_v54 }
 0x394   :  { %1968 = vmatpush.bf16.msra.mxu3 %v2803_v24 }
 0x398   :  { %1969 = vmatpush.bf16.msra.mxu3 %v2802_v0 }
 0x39c   :  { %1970 = vmatpush.bf16.msra.mxu3 %v2801_v55 }
 0x3a0   :  { %1971 = vmatpush.bf16.msra.mxu3 %v2800_v27 }
 0x3d6   :  { %v1319_v63 = vpop.f32.mrf.mxu3 }
 0x3d7   :  { %v1323_v56 = vpack.c.bf16 %v1319_v63, %v1319_v63  ;;  %v2808_v63 = vld [vmem:[#allocation7] sm:$0xff] }
 0x3d8   :  { %2054 = vmatpush.bf16.msrb.mxu1 %v2808_v63 }
 0x3d9   :  { %1827 = vmatmul.bf16.vlgmr.msrb.gmra.mxu3 %v1323_v56  ;;  %v2838_v56 = vld [vmem:[%s3787_s11] ss:$0 sm:$0xff] }
 0x3de   :  { %v1321_v34 = vpop.f32.mrf.mxu3 }
 0x3e6   :  { %v1429_v51 = vpop.f32.mrf.mxu3 }
 0x3e7   :  { %v1433_v5 = vpack.c.bf16 %v1429_v51, %v1429_v51 }
 0x3e9   :  { %1840 = vmatmul.bf16.vlgmr.msra.gmra.mxu1 %v1433_v5 }
 0x3ee   :  { %v1431_v10 = vpop.f32.mrf.mxu3 }
 0x3f6   :  { %v1541_v21 = vpop.f32.mrf.mxu3  ;;  %v1815_v50 = vpop.f32.mrf.mxu2 }
 0x3f7   :  { %v1545_v14 = vpack.c.bf16 %v1541_v21, %v1541_v21  ;;  %v1816_v33 = vadd.f32 %v2835_v29, %v1815_v50  ;;  %v2839_v50 = vld [vmem:[%s3789_s13] ss:$0 sm:$0xff] }
 0x3f9   :  { %1853 = vmatmul.bf16.vlgmr.msra.gmra.mxu2 %v1545_v14 }
 0x3fe   :  { %v1543_v11 = vpop.f32.mrf.mxu3  ;;  %v1817_v38 = vpop.f32.mrf.mxu2 }
 0x45c   :  { %v1828_v12 = vpop.f32.mrf.mxu3 }
 0x45d   :  { %v1829_v9 = vadd.f32 %v1828_v12, %v1816_v33 }
 0x464   :  { %v1830_v16 = vpop.f32.mrf.mxu3 }
 0x466   :  { %v1841_v17 = vpop.f32.mrf.mxu1 }
 0x467   :  { %v1842_v19 = vadd.f32 %v1841_v17, %v1829_v9 }
 0x46e   :  { %v1843_v26 = vpop.f32.mrf.mxu1 }
 0x47c   :  { %v1854_v4 = vpop.f32.mrf.mxu2 }
 0x47d   :  { %v1855_v15 = vadd.f32 %v1854_v4, %v1842_v19 }
 0x47f   :  { %1860 = vadd.xlane.f32.xlu2 %v1855_v15 }
 0x484   :  { %v1856_v28 = vpop.f32.mrf.mxu2 }
 0x4f2   :  { %v1861_v37 = vpop.xlane.xlu2 %1860 }
 0x4f3   :  { %v1869_v62 = vmul.f32 %v3749_v49, %v1861_v37 }
 0x4f5   :  { %v1870_v2 = vsub.f32 %v1855_v15, %v1869_v62 }
 0x4f7   :  { %v1871_v3 = vmul.f32 %v1870_v2, %v1870_v2 }
 0x4f9   :  { %1872 = vadd.xlane.f32.xlu0 %v1871_v3 }
 0x56c   :  { %v1873_v31 = vpop.xlane.xlu0 %1872 }
 0x56d   :  { %v1874_v32 = vmul.f32 %v1873_v31, %v3749_v49 }
 0x56f   :  { %v1875_v39 = vadd.f32 1e-05, %v1874_v32 }
 0x571   :  { %2860 = vrsqrt.f32 %v1875_v39  ;;  %vm1882_vm4 = vweird.f32 %v1875_v39 }
 0x577   :  { %v2861_v43 = vpop.eup %2860 }
 0x578   :  { %v1877_v57 = vmul.f32 %v2861_v43, %v1875_v39  ;;  %vm1883_vm3 = vweird.f32 %v2861_v43 }
 0x579   :  { %vm1884_vm5 = vmor %vm1882_vm4, %vm1883_vm3 }
 0x57a   :  { %v1878_v59 = vmul.f32 %v2861_v43, %v1877_v57 }
 0x57c   :  { %v1879_v42 = vmul.f32 0.5, %v1878_v59 }
 0x57e   :  { %v1880_v7 = vsub.f32 1.5, %v1879_v42 }
 0x580   :  { %v1881_v61 = vmul.f32 %v2861_v43, %v1880_v7 }
 0x582   :  { %v1885_v6 = vsel %vm1884_vm5, %v2861_v43, %v1881_v61 }
 0x583   :  { %v1886_v52 = vmul.f32 %v1885_v6, %v1870_v2 }
 0x585   :  { %v1890_v22 = vmul.f32 %v2836_v45, %v1886_v52 }
 0x587   :  { %v1894_v8 = vadd.f32 %v2837_v20, %v1890_v22 }
 0x589   :  { %v1895_v23 = vpack.c.bf16 %v1894_v8, %v1894_v8 }
 0x58b   :  { %1972 = vmatmul.bf16.vlgmr.msra.gmra.mxu3 %v1895_v23 }
 0x60e   :  { %v1973_v34 = vpop.f32.mrf.mxu3 }
 0x60f   :  { %v1974_v51 = vadd.f32 %v2838_v56, %v1973_v34 }
 0x611   :  { %v1977_v5 = vmax.f32 %v1974_v51, 0.0 }
 0x613   :  { %v1978_v10 = vpack.c.bf16 %v1977_v5, %v1977_v5 }
 0x615   :  { %2055 = vmatmul.bf16.vlgmr.msrb.gmra.mxu1 %v1978_v10 }
 0x616   :  { %v1975_v21 = vpop.f32.mrf.mxu3 }
 0x692   :  { %v2056_v14 = vpop.f32.mrf.mxu1 }
 0x693   :  { %v2057_v11 = vadd.f32 %v2839_v50, %v2056_v14 }
 0x695   :  { %v2060_v38 = vadd.f32 %v2057_v11, %v1894_v8 }
 0x697   :  { %2063 = vadd.xlane.f32.xlu1 %v2060_v38 }
 0x69a   :  { %v2058_v12 = vpop.f32.mrf.mxu1 }
 0x70a   :  { %v2064_v16 = vpop.xlane.xlu1 %2063 }
 0x70b   :  { %v2065_v17 = vmul.f32 %v2064_v16, %v3749_v49 }
 0x70d   :  { %v2066_v26 = vsub.f32 %v2060_v38, %v2065_v17 }
 0x70f   :  { %v2067_v29 = vmul.f32 %v2066_v26, %v2066_v26 }
 0x711   :  { %2068 = vadd.xlane.f32.xlu2 %v2067_v29 }
 0x784   :  { %v2069_v33 = vpop.xlane.xlu2 %2068 }
 0x785   :  { %v2070_v9 = vmul.f32 %v2069_v33, %v3749_v49 }
 0x787   :  { %v2071_v19 = vadd.f32 1e-05, %v2070_v9 }
 0x789   :  { %2862 = vrsqrt.f32 %v2071_v19  ;;  %vm2078_vm7 = vweird.f32 %v2071_v19 }
 0x78f   :  { %v2863_v4 = vpop.eup %2862 }
 0x790   :  { %v2073_v15 = vmul.f32 %v2863_v4, %v2071_v19  ;;  %vm2079_vm6 = vweird.f32 %v2863_v4 }
 0x791   :  { %vm2080_vm8 = vmor %vm2078_vm7, %vm2079_vm6 }
 0x792   :  { %v2074_v28 = vmul.f32 %v2863_v4, %v2073_v15 }
 0x794   :  { %v2075_v60 = vmul.f32 0.5, %v2074_v28 }
 0x796   :  { %v2076_v13 = vsub.f32 1.5, %v2075_v60 }
 0x798   :  { %v2077_v35 = vmul.f32 %v2863_v4, %v2076_v13 }
 0x79a   :  { %v2081_v1 = vsel %vm2080_vm8, %v2863_v4, %v2077_v35 }
 0x79b   :  { %v2082_v18 = vmul.f32 %v2081_v1, %v2066_v26 }
 0x79d   :  { %v2086_v49 = vmul.f32 %v2840_v40, %v2082_v18 }
 0x79f   :  { %v2090_v37 = vadd.f32 %v2841_v25, %v2086_v49 }
 0x7a1   :  { %v2091_v62 = vpack.c.bf16 %v2090_v37, %v2090_v37 }
 0x7a3   :  { %2092 = vst [vmem:[#allocation8] sm:$0xf] %v2091_v62 }
 0x7a4   :  { %2103 = dma.vmem_to_hbm [thread:$0]  %s2099_s3, 64, %s2101_s2, [#allocation4]  }
 0x7a5   :  { %2964 = dma.done.wait [#allocation4], 64  }
 0x7a6   :  { %2965 = vsyncadd [#allocation4], 4294967232 }
 0x7a7   :  { %2108 = vsyncpa [#allocation3], 1 }
 0x7a8   :  { %2109 = vsyncpa [#allocation6], 1 }
 0x7a9   :  { %2110 = vsyncpa [#allocation4], 1 }

</bundles_post_ra>
